<compile_context>
chip_gen: v6e
topology: v6e:2x2x1
jax: 0.10.0
libtpu: 0.0.40
codegen_flags: <defaults>
</compile_context>

<pallas_src>
import functools

import jax
import jax.numpy as jnp
from jax.experimental import pallas as pl
from jax.experimental.pallas import tpu as pltpu


def _round_up(x, m):
    return ((x + m - 1) // m) * m


# ------------------------------ fused kernel -------------------------------

def _fused_rgcn_kernel(adj_ref, x_ref, wcat_ref, b_ref, out_ref, slab_ref,
                       *, num_layers, num_slots, n_pad, d_pad, relu_flags):
    """All layers, all relations (+ folded self-loop) in one invocation.

    adj_ref  : (NP, S*NP)     bf16  [A_0 | ... | A_{R-1} | I] right-normalized,
                                    relations concatenated along the src (K) axis.
    x_ref    : (NP, DP)       bf16  zero-padded input node features.
    wcat_ref : (L, DP, S*DP)  bf16  [W_0 | ... | W_{R-1} | W_loop] per layer.
    b_ref    : (L, 1, DP)     f32   per-layer bias.
    out_ref  : (NP, DP)       f32   final-layer output (padded).
    slab_ref : (S*NP, DP)     bf16  scratch: row-stacked [h @ W_s] over slots s.
    """
    h = x_ref[...]                                  # bf16 (NP, DP), on-chip resident

    for l in range(num_layers):                     # static unroll over layers
        # Stage 1: ONE matmul per layer against the column-concatenated weights.
        hw = jnp.dot(h, wcat_ref[l], preferred_element_type=jnp.float32)

        # Re-tile the lane-aligned column slices into the row-stacked slab.
        for s in range(num_slots):                  # static unroll, S = R+1 is tiny
            slab_ref[s * n_pad:(s + 1) * n_pad, :] = (
                hw[:, s * d_pad:(s + 1) * d_pad].astype(slab_ref.dtype))

        # Stage 2: sum_r A_r (h W_r) + h W_loop  ==  adj_cat @ slab, K = S*NP.
        # adj streamed from VMEM at the use site (not pinned in vregs across layers).
        hf = jnp.dot(adj_ref[...], slab_ref[...],
                     preferred_element_type=jnp.float32) + b_ref[l]
        if relu_flags[l]:
            hf = jnp.maximum(hf, 0.0)

        if l == num_layers - 1:
            out_ref[...] = hf.astype(out_ref.dtype)
        else:
            h = hf.astype(h.dtype)                  # back to bf16 for next layer


# ------------------------------ host wrapper -------------------------------

def make_rgcn_forward(params, adj_norm):
    """One-time graph/weight packing; returns a jitted forward: x (N, Din) -> (N, Dout)."""
    R, N, _ = adj_norm.shape
    L = len(params)
    S = R + 1                                      # relations + self-loop slot
    d_in = params[0]["loop_weight"].shape[0]
    d_out = params[-1]["loop_weight"].shape[1]
    dims = [d_in] + [p["loop_weight"].shape[1] for p in params]
    DP = _round_up(max(dims), 128)                 # common padded feature width
    NP = _round_up(N, 128)                         # padded node count
    f32, bf16 = jnp.float32, jnp.bfloat16

    # ---- one-time packing (NOT in the per-call path) ----
    # Relation-concatenated adjacency with the self-loop folded in as an identity
    # block (exact in bf16):  (NP, S*NP).
    adj_p = jnp.zeros((S, NP, NP), f32)
    adj_p = adj_p.at[:R, :N, :N].set(adj_norm)
    adj_p = adj_p.at[R, :N, :N].set(jnp.eye(N, dtype=f32))
    adj_cat = adj_p.transpose(1, 0, 2).reshape(NP, S * NP).astype(bf16)

    # Column-concatenated, zero-padded weights per layer: (L, DP, S*DP).
    w_cat = jnp.zeros((L, DP, S * DP), f32)
    b_all = jnp.zeros((L, 1, DP), f32)
    relu_flags = []
    for li, p in enumerate(params):
        di, do = p["loop_weight"].shape
        for r in range(R):
            w_cat = w_cat.at[li, :di, r * DP:r * DP + do].set(p["weight"][r])
        w_cat = w_cat.at[li, :di, R * DP:R * DP + do].set(p["loop_weight"])
        b_all = b_all.at[li, :, :do].set(p["bias"])
        relu_flags.append(bool(p["apply_relu"]))
    w_cat = w_cat.astype(bf16)
    relu_flags = tuple(relu_flags)

    kernel = functools.partial(
        _fused_rgcn_kernel, num_layers=L, num_slots=S,
        n_pad=NP, d_pad=DP, relu_flags=relu_flags)

    flops = int(2 * L * S * NP * DP * (DP + NP))
    bytes_accessed = int(adj_cat.size * 2 + NP * DP * 2 + w_cat.size * 2
                         + b_all.size * 4 + NP * DP * 4)
    vmem_spec = pl.BlockSpec(memory_space=pltpu.MemorySpace.VMEM)

    call = pl.pallas_call(
        kernel,
        out_shape=jax.ShapeDtypeStruct((NP, DP), jnp.float32),
        in_specs=[vmem_spec] * 4,
        out_specs=vmem_spec,
        scratch_shapes=[pltpu.VMEM((S * NP, DP), bf16)],
        compiler_params=pltpu.CompilerParams(vmem_limit_bytes=8 * 1024 * 1024),
        cost_estimate=pl.CostEstimate(flops=flops, transcendentals=0,
                                      bytes_accessed=bytes_accessed),
    )
    # TODO(synk): for large N, split into per-layer pallas_calls (h round-trips HBM)
    # and tile dst rows with a "parallel" grid axis; size adj tiles for v7x's 64 MiB
    # physical / 32 MiB scoped-default VMEM rather than v6e's 128 MiB.

    @jax.jit
    def forward(x):
        x_p = jnp.zeros((NP, DP), bf16).at[:N, :d_in].set(x.astype(bf16))
        out_p = call(adj_cat, x_p, w_cat, b_all)
        return out_p[:N, :d_out]

    return forward


# ------------------------- parameter / graph setup -------------------------

def xavier_uniform(key, shape, gain):
    fan_in, fan_out = shape[-2], shape[-1]
    a = gain * jnp.sqrt(6.0 / (fan_in + fan_out))
    return jax.random.uniform(key, shape, jnp.float32, -a, a)


def make_rgcn_params(key, in_dim, hidden_dim, out_dim, num_rels):
    """3 layers: in->hid (relu), hid->hid (relu), hid->out (no act).
       num_bases == num_rels -> direct per-relation weights (no basis)."""
    gain = jnp.sqrt(2.0)  # nn.init.calculate_gain('relu')
    dims = [(in_dim, hidden_dim), (hidden_dim, hidden_dim), (hidden_dim, out_dim)]
    params = []
    for li, (di, do) in enumerate(dims):
        k_w, k_l, key = jax.random.split(key, 3)
        params.append(dict(
            weight=xavier_uniform(k_w, (num_rels, di, do), gain),
            loop_weight=xavier_uniform(k_l, (di, do), gain),
            bias=jnp.zeros((1, do), jnp.float32),       # nn.init.zeros_
            apply_relu=(li < 2),
        ))
    return params


def make_graph(key, num_rels, num_nodes, p_edge=0.2):
    """Dense per-relation adjacency (dst x src), right-normalized as in DGL
       GraphConv(norm='right'): divide by dst in-degree clamped to >= 1."""
    adj = (jax.random.uniform(key, (num_rels, num_nodes, num_nodes)) < p_edge
           ).astype(jnp.float32)
    deg = jnp.maximum(adj.sum(axis=-1, keepdims=True), 1.0)
    return adj / deg


def rgcn_reference(params, adj_norm, x):
    h = x
    for p in params:
        msg = jnp.einsum("rij,rjk->ik", adj_norm,
                         jnp.einsum("jd,rdk->rjk", h, p["weight"]))
        h = msg + h @ p["loop_weight"] + p["bias"]
        if p["apply_relu"]:
            h = jnp.maximum(h, 0.0)
    return h


if __name__ == "__main__":
    key = jax.random.PRNGKey(0)
    k_graph, k_feat, k_params = jax.random.split(key, 3)

    num_nodes = 64
    num_rels = 3          # len(rel_names)
    in_dim = 32
    hidden_dim = 32
    out_dim = 16

    adj_norm = make_graph(k_graph, num_rels, num_nodes)
    x = jax.random.normal(k_feat, (num_nodes, in_dim), jnp.float32)
    params = make_rgcn_params(k_params, in_dim, hidden_dim, out_dim, num_rels)

    rgcn_forward = make_rgcn_forward(params, adj_norm)   # one-time packing
    out = jax.block_until_ready(rgcn_forward(x))

    ref = rgcn_reference(params, adj_norm, x)
    assert out.shape == (num_nodes, out_dim)
    assert jnp.allclose(out, ref, atol=1e-1, rtol=5e-2), "mismatch vs reference"

    print("KERNEL_OK")
</pallas_src>

<mosaic_0001>
module attributes {stable_mosaic.version = 11 : i64} {
  func.func @_fused_rgcn_kernel(%arg0: memref<128x512xbf16, #tpu.memory_space<vmem>>, %arg1: memref<128x128xbf16, #tpu.memory_space<vmem>>, %arg2: memref<3x128x512xbf16, #tpu.memory_space<vmem>>, %arg3: memref<3x1x128xf32, #tpu.memory_space<vmem>>, %arg4: memref<128x128xf32, #tpu.memory_space<vmem>>, %arg5: memref<512x128xbf16, #tpu.memory_space<vmem>>) attributes {dimension_semantics = [], scalar_prefetch = 0 : i64, scratch_operands = 1 : i64, tpu.core_type = #tpu.core_type<tc>} {
    %c0 = arith.constant 0 : index
    %c0_0 = arith.constant 0 : index
    %0 = vector.load %arg1[%c0, %c0_0] : memref<128x128xbf16, #tpu.memory_space<vmem>>, vector<128x128xbf16>
    %c0_1 = arith.constant 0 : index
    %c0_2 = arith.constant 0 : index
    %c0_3 = arith.constant 0 : index
    %1 = vector.load %arg2[%c0_1, %c0_2, %c0_3] : memref<3x128x512xbf16, #tpu.memory_space<vmem>>, vector<1x128x512xbf16>
    %2 = vector.shape_cast %1 : vector<1x128x512xbf16> to vector<128x512xbf16>
    %cst = arith.constant dense<0.000000e+00> : vector<128x512xf32>
    %3 = tpu.matmul %0, %2, %cst {dimension_numbers = #tpu.dot_dimension_numbers<[1], [0], [0], [1], [0, 0, 1, 1], [], []>} : vector<128x128xbf16>, vector<128x512xbf16>, vector<128x512xf32> -> vector<128x512xf32>
    %4 = vector.extract_strided_slice %3 {offsets = [0, 0], sizes = [128, 128], strides = [1, 1]} : vector<128x512xf32> to vector<128x128xf32>
    %5 = arith.truncf %4 : vector<128x128xf32> to vector<128x128xbf16>
    %c0_4 = arith.constant 0 : index
    %c0_5 = arith.constant 0 : index
    %6 = vector.load %arg5[%c0_4, %c0_5] : memref<512x128xbf16, #tpu.memory_space<vmem>>, vector<128x128xbf16>
    tpu.vector_store %arg5[%c0_4, %c0_5], %5 {strides = array<i32>} : memref<512x128xbf16, #tpu.memory_space<vmem>>, vector<128x128xbf16>,
    %7 = vector.extract_strided_slice %3 {offsets = [0, 128], sizes = [128, 128], strides = [1, 1]} : vector<128x512xf32> to vector<128x128xf32>
    %8 = arith.truncf %7 : vector<128x128xf32> to vector<128x128xbf16>
    %c128 = arith.constant 128 : index
    %c0_6 = arith.constant 0 : index
    %9 = vector.load %arg5[%c128, %c0_6] : memref<512x128xbf16, #tpu.memory_space<vmem>>, vector<128x128xbf16>
    tpu.vector_store %arg5[%c128, %c0_6], %8 {strides = array<i32>} : memref<512x128xbf16, #tpu.memory_space<vmem>>, vector<128x128xbf16>,
    %10 = vector.extract_strided_slice %3 {offsets = [0, 256], sizes = [128, 128], strides = [1, 1]} : vector<128x512xf32> to vector<128x128xf32>
    %11 = arith.truncf %10 : vector<128x128xf32> to vector<128x128xbf16>
    %c256 = arith.constant 256 : index
    %c0_7 = arith.constant 0 : index
    %12 = vector.load %arg5[%c256, %c0_7] : memref<512x128xbf16, #tpu.memory_space<vmem>>, vector<128x128xbf16>
    tpu.vector_store %arg5[%c256, %c0_7], %11 {strides = array<i32>} : memref<512x128xbf16, #tpu.memory_space<vmem>>, vector<128x128xbf16>,
    %13 = vector.extract_strided_slice %3 {offsets = [0, 384], sizes = [128, 128], strides = [1, 1]} : vector<128x512xf32> to vector<128x128xf32>
    %14 = arith.truncf %13 : vector<128x128xf32> to vector<128x128xbf16>
    %c384 = arith.constant 384 : index
    %c0_8 = arith.constant 0 : index
    %15 = vector.load %arg5[%c384, %c0_8] : memref<512x128xbf16, #tpu.memory_space<vmem>>, vector<128x128xbf16>
    tpu.vector_store %arg5[%c384, %c0_8], %14 {strides = array<i32>} : memref<512x128xbf16, #tpu.memory_space<vmem>>, vector<128x128xbf16>,
    %c0_9 = arith.constant 0 : index
    %c0_10 = arith.constant 0 : index
    %16 = vector.load %arg0[%c0_9, %c0_10] : memref<128x512xbf16, #tpu.memory_space<vmem>>, vector<128x512xbf16>
    %c0_11 = arith.constant 0 : index
    %c0_12 = arith.constant 0 : index
    %17 = vector.load %arg5[%c0_11, %c0_12] : memref<512x128xbf16, #tpu.memory_space<vmem>>, vector<512x128xbf16>
    %cst_13 = arith.constant dense<0.000000e+00> : vector<128x128xf32>
    %18 = tpu.matmul %16, %17, %cst_13 {dimension_numbers = #tpu.dot_dimension_numbers<[1], [0], [0], [1], [0, 0, 1, 1], [], []>} : vector<128x512xbf16>, vector<512x128xbf16>, vector<128x128xf32> -> vector<128x128xf32>
    %c0_14 = arith.constant 0 : index
    %c0_15 = arith.constant 0 : index
    %c0_16 = arith.constant 0 : index
    %19 = vector.load %arg3[%c0_14, %c0_15, %c0_16] : memref<3x1x128xf32, #tpu.memory_space<vmem>>, vector<1x1x128xf32>
    %20 = vector.shape_cast %19 : vector<1x1x128xf32> to vector<1x128xf32>
    %21 = vector.broadcast %20 : vector<1x128xf32> to vector<128x128xf32>
    %22 = arith.addf %18, %21 : vector<128x128xf32>
    %cst_17 = arith.constant 0.000000e+00 : f32
    %23 = vector.broadcast %cst_17 : f32 to vector<128x128xf32>
    %24 = arith.maximumf %22, %23 : vector<128x128xf32>
    %25 = arith.truncf %24 : vector<128x128xf32> to vector<128x128xbf16>
    %c1 = arith.constant 1 : index
    %c0_18 = arith.constant 0 : index
    %c0_19 = arith.constant 0 : index
    %26 = vector.load %arg2[%c1, %c0_18, %c0_19] : memref<3x128x512xbf16, #tpu.memory_space<vmem>>, vector<1x128x512xbf16>
    %27 = vector.shape_cast %26 : vector<1x128x512xbf16> to vector<128x512xbf16>
    %cst_20 = arith.constant dense<0.000000e+00> : vector<128x512xf32>
    %28 = tpu.matmul %25, %27, %cst_20 {dimension_numbers = #tpu.dot_dimension_numbers<[1], [0], [0], [1], [0, 0, 1, 1], [], []>} : vector<128x128xbf16>, vector<128x512xbf16>, vector<128x512xf32> -> vector<128x512xf32>
    %29 = vector.extract_strided_slice %28 {offsets = [0, 0], sizes = [128, 128], strides = [1, 1]} : vector<128x512xf32> to vector<128x128xf32>
    %30 = arith.truncf %29 : vector<128x128xf32> to vector<128x128xbf16>
    %c0_21 = arith.constant 0 : index
    %c0_22 = arith.constant 0 : index
    %31 = vector.load %arg5[%c0_21, %c0_22] : memref<512x128xbf16, #tpu.memory_space<vmem>>, vector<128x128xbf16>
    tpu.vector_store %arg5[%c0_21, %c0_22], %30 {strides = array<i32>} : memref<512x128xbf16, #tpu.memory_space<vmem>>, vector<128x128xbf16>,
    %32 = vector.extract_strided_slice %28 {offsets = [0, 128], sizes = [128, 128], strides = [1, 1]} : vector<128x512xf32> to vector<128x128xf32>
    %33 = arith.truncf %32 : vector<128x128xf32> to vector<128x128xbf16>
    %c128_23 = arith.constant 128 : index
    %c0_24 = arith.constant 0 : index
    %34 = vector.load %arg5[%c128_23, %c0_24] : memref<512x128xbf16, #tpu.memory_space<vmem>>, vector<128x128xbf16>
    tpu.vector_store %arg5[%c128_23, %c0_24], %33 {strides = array<i32>} : memref<512x128xbf16, #tpu.memory_space<vmem>>, vector<128x128xbf16>,
    %35 = vector.extract_strided_slice %28 {offsets = [0, 256], sizes = [128, 128], strides = [1, 1]} : vector<128x512xf32> to vector<128x128xf32>
    %36 = arith.truncf %35 : vector<128x128xf32> to vector<128x128xbf16>
    %c256_25 = arith.constant 256 : index
    %c0_26 = arith.constant 0 : index
    %37 = vector.load %arg5[%c256_25, %c0_26] : memref<512x128xbf16, #tpu.memory_space<vmem>>, vector<128x128xbf16>
    tpu.vector_store %arg5[%c256_25, %c0_26], %36 {strides = array<i32>} : memref<512x128xbf16, #tpu.memory_space<vmem>>, vector<128x128xbf16>,
    %38 = vector.extract_strided_slice %28 {offsets = [0, 384], sizes = [128, 128], strides = [1, 1]} : vector<128x512xf32> to vector<128x128xf32>
    %39 = arith.truncf %38 : vector<128x128xf32> to vector<128x128xbf16>
    %c384_27 = arith.constant 384 : index
    %c0_28 = arith.constant 0 : index
    %40 = vector.load %arg5[%c384_27, %c0_28] : memref<512x128xbf16, #tpu.memory_space<vmem>>, vector<128x128xbf16>
    tpu.vector_store %arg5[%c384_27, %c0_28], %39 {strides = array<i32>} : memref<512x128xbf16, #tpu.memory_space<vmem>>, vector<128x128xbf16>,
    %c0_29 = arith.constant 0 : index
    %c0_30 = arith.constant 0 : index
    %41 = vector.load %arg0[%c0_29, %c0_30] : memref<128x512xbf16, #tpu.memory_space<vmem>>, vector<128x512xbf16>
    %c0_31 = arith.constant 0 : index
    %c0_32 = arith.constant 0 : index
    %42 = vector.load %arg5[%c0_31, %c0_32] : memref<512x128xbf16, #tpu.memory_space<vmem>>, vector<512x128xbf16>
    %cst_33 = arith.constant dense<0.000000e+00> : vector<128x128xf32>
    %43 = tpu.matmul %41, %42, %cst_33 {dimension_numbers = #tpu.dot_dimension_numbers<[1], [0], [0], [1], [0, 0, 1, 1], [], []>} : vector<128x512xbf16>, vector<512x128xbf16>, vector<128x128xf32> -> vector<128x128xf32>
    %c1_34 = arith.constant 1 : index
    %c0_35 = arith.constant 0 : index
    %c0_36 = arith.constant 0 : index
    %44 = vector.load %arg3[%c1_34, %c0_35, %c0_36] : memref<3x1x128xf32, #tpu.memory_space<vmem>>, vector<1x1x128xf32>
    %45 = vector.shape_cast %44 : vector<1x1x128xf32> to vector<1x128xf32>
    %46 = vector.broadcast %45 : vector<1x128xf32> to vector<128x128xf32>
    %47 = arith.addf %43, %46 : vector<128x128xf32>
    %cst_37 = arith.constant 0.000000e+00 : f32
    %48 = vector.broadcast %cst_37 : f32 to vector<128x128xf32>
    %49 = arith.maximumf %47, %48 : vector<128x128xf32>
    %50 = arith.truncf %49 : vector<128x128xf32> to vector<128x128xbf16>
    %c2 = arith.constant 2 : index
    %c0_38 = arith.constant 0 : index
    %c0_39 = arith.constant 0 : index
    %51 = vector.load %arg2[%c2, %c0_38, %c0_39] : memref<3x128x512xbf16, #tpu.memory_space<vmem>>, vector<1x128x512xbf16>
    %52 = vector.shape_cast %51 : vector<1x128x512xbf16> to vector<128x512xbf16>
    %cst_40 = arith.constant dense<0.000000e+00> : vector<128x512xf32>
    %53 = tpu.matmul %50, %52, %cst_40 {dimension_numbers = #tpu.dot_dimension_numbers<[1], [0], [0], [1], [0, 0, 1, 1], [], []>} : vector<128x128xbf16>, vector<128x512xbf16>, vector<128x512xf32> -> vector<128x512xf32>
    %54 = vector.extract_strided_slice %53 {offsets = [0, 0], sizes = [128, 128], strides = [1, 1]} : vector<128x512xf32> to vector<128x128xf32>
    %55 = arith.truncf %54 : vector<128x128xf32> to vector<128x128xbf16>
    %c0_41 = arith.constant 0 : index
    %c0_42 = arith.constant 0 : index
    %56 = vector.load %arg5[%c0_41, %c0_42] : memref<512x128xbf16, #tpu.memory_space<vmem>>, vector<128x128xbf16>
    tpu.vector_store %arg5[%c0_41, %c0_42], %55 {strides = array<i32>} : memref<512x128xbf16, #tpu.memory_space<vmem>>, vector<128x128xbf16>,
    %57 = vector.extract_strided_slice %53 {offsets = [0, 128], sizes = [128, 128], strides = [1, 1]} : vector<128x512xf32> to vector<128x128xf32>
    %58 = arith.truncf %57 : vector<128x128xf32> to vector<128x128xbf16>
    %c128_43 = arith.constant 128 : index
    %c0_44 = arith.constant 0 : index
    %59 = vector.load %arg5[%c128_43, %c0_44] : memref<512x128xbf16, #tpu.memory_space<vmem>>, vector<128x128xbf16>
    tpu.vector_store %arg5[%c128_43, %c0_44], %58 {strides = array<i32>} : memref<512x128xbf16, #tpu.memory_space<vmem>>, vector<128x128xbf16>,
    %60 = vector.extract_strided_slice %53 {offsets = [0, 256], sizes = [128, 128], strides = [1, 1]} : vector<128x512xf32> to vector<128x128xf32>
    %61 = arith.truncf %60 : vector<128x128xf32> to vector<128x128xbf16>
    %c256_45 = arith.constant 256 : index
    %c0_46 = arith.constant 0 : index
    %62 = vector.load %arg5[%c256_45, %c0_46] : memref<512x128xbf16, #tpu.memory_space<vmem>>, vector<128x128xbf16>
    tpu.vector_store %arg5[%c256_45, %c0_46], %61 {strides = array<i32>} : memref<512x128xbf16, #tpu.memory_space<vmem>>, vector<128x128xbf16>,
    %63 = vector.extract_strided_slice %53 {offsets = [0, 384], sizes = [128, 128], strides = [1, 1]} : vector<128x512xf32> to vector<128x128xf32>
    %64 = arith.truncf %63 : vector<128x128xf32> to vector<128x128xbf16>
    %c384_47 = arith.constant 384 : index
    %c0_48 = arith.constant 0 : index
    %65 = vector.load %arg5[%c384_47, %c0_48] : memref<512x128xbf16, #tpu.memory_space<vmem>>, vector<128x128xbf16>
    tpu.vector_store %arg5[%c384_47, %c0_48], %64 {strides = array<i32>} : memref<512x128xbf16, #tpu.memory_space<vmem>>, vector<128x128xbf16>,
    %c0_49 = arith.constant 0 : index
    %c0_50 = arith.constant 0 : index
    %66 = vector.load %arg0[%c0_49, %c0_50] : memref<128x512xbf16, #tpu.memory_space<vmem>>, vector<128x512xbf16>
    %c0_51 = arith.constant 0 : index
    %c0_52 = arith.constant 0 : index
    %67 = vector.load %arg5[%c0_51, %c0_52] : memref<512x128xbf16, #tpu.memory_space<vmem>>, vector<512x128xbf16>
    %cst_53 = arith.constant dense<0.000000e+00> : vector<128x128xf32>
    %68 = tpu.matmul %66, %67, %cst_53 {dimension_numbers = #tpu.dot_dimension_numbers<[1], [0], [0], [1], [0, 0, 1, 1], [], []>} : vector<128x512xbf16>, vector<512x128xbf16>, vector<128x128xf32> -> vector<128x128xf32>
    %c2_54 = arith.constant 2 : index
    %c0_55 = arith.constant 0 : index
    %c0_56 = arith.constant 0 : index
    %69 = vector.load %arg3[%c2_54, %c0_55, %c0_56] : memref<3x1x128xf32, #tpu.memory_space<vmem>>, vector<1x1x128xf32>
    %70 = vector.shape_cast %69 : vector<1x1x128xf32> to vector<1x128xf32>
    %71 = vector.broadcast %70 : vector<1x128xf32> to vector<128x128xf32>
    %72 = arith.addf %68, %71 : vector<128x128xf32>
    %c0_57 = arith.constant 0 : index
    %c0_58 = arith.constant 0 : index
    %73 = vector.load %arg4[%c0_57, %c0_58] : memref<128x128xf32, #tpu.memory_space<vmem>>, vector<128x128xf32>
    tpu.vector_store %arg4[%c0_57, %c0_58], %72 {strides = array<i32>} : memref<128x128xf32, #tpu.memory_space<vmem>>, vector<128x128xf32>,
    return
  }
}

</mosaic_0001>

<bundles_post_ra>
// kernel: forward.1
= control target key start
LH: loop header
LB: loop body
LE: loop exit
PB: predicated region body
PF: predicated region fallthrough
CT: control target
= control target key end

     0   :  { %9 = vsyncpa [#allocation4], 0  ;;  %s6647_s0 = inlined_call_operand.hbm [shape: bf16[128,512], index: 0, kind: input, shape index: {}]   ;;  %s6648_s1 = inlined_call_operand.vmem [shape: bf16[128,128], index: 1, kind: input, shape index: {}]   ;;  %s6649_s2 = inlined_call_operand.hbm [shape: bf16[3,128,512], index: 2, kind: input, shape index: {}]   ;;  %s6650_s3 = inlined_call_operand.vmem [shape: f32[3,1,128], index: 3, kind: input, shape index: {}]   ;;  %s6651_s4 = inlined_call_operand.vmem [shape: f32[128,128], index: 4, kind: output, shape index: {}]  }
   0x1   :  { %10 = vsyncpa [#allocation6], 0  ;;  %s6428_s15 = smov [#allocation3]  }
   0x2   :  { %s16_s16 = sshll.u32 %s6428_s15, 4  ;;  %s17_s16 = int_to_ptr.vmem [resolvable:$true] %s16_s16 }
   0x3   :  { %s6392_s17 = scalar_lea.vmem %s17_s16, 4096  ;;  %p6397_p1 = scmp.lt.s32.totalorder %s17_s16, %s17_s16 }
   0x4   :  { %p6393_p0 = scmp.ne.s32.totalorder %s17_s16, %s6392_s17  ;;  %p6398_p2 = scmp.lt.s32.totalorder %s6392_s17, %s6392_s17 }
   0x6   :  { %p6399_p3 = por %p6398_p2, %p6397_p1 }
   0x8   :  { %p6400_p4 = pnand %p6399_p3, %p6393_p0 }
   0xa   :  { %6403 = shalt.err (!%p6400_p4)
}
   0xb   :  { %s6429_s18 = smov 256   ;;  %s6430_s19 = smov 16  }
   0xc   :  { %22 = dma.hbm_to_vmem [thread:$0]  %s6647_s0, 4096, %s17_s16, [#allocation4], %s6429_s18, %s6429_s18, %s6430_s19  }
   0xd   :  { %s6431_s22 = smov [#allocation5]  }
   0xe   :  { %s30_s23 = sshll.u32 %s6431_s22, 4  ;;  %s31_s23 = int_to_ptr.vmem [resolvable:$true] %s30_s23 }
   0xf   :  { %s6412_s24 = scalar_lea.vmem %s31_s23, 12288  ;;  %p6417_p6 = scmp.lt.s32.totalorder %s31_s23, %s31_s23 }
  0x10   :  { %p6413_p5 = scmp.ne.s32.totalorder %s31_s23, %s6412_s24  ;;  %p6418_p7 = scmp.lt.s32.totalorder %s6412_s24, %s6412_s24 }
  0x12   :  { %p6419_p8 = por %p6418_p7, %p6417_p6 }
  0x14   :  { %p6420_p9 = pnand %p6419_p8, %p6413_p5 }
  0x16   :  { %6423 = shalt.err (!%p6420_p9)
}
  0x17   :  { %36 = dma.hbm_to_vmem [thread:$0]  %s6649_s2, 12288, %s31_s23, [#allocation6], %s6429_s18, %s6429_s18, %s6430_s19  }
  0x18   :  { %6424 = dma.done.wait [#allocation4], 4096  }
  0x19   :  { %6425 = vsyncadd [#allocation4], 4294963200 }
  0x1a   :  { %6426 = dma.done.wait [#allocation6], 12288  }
  0x1b   :  { %6427 = vsyncadd [#allocation6], 4294955008  ;;  %v6432_v0 = vmov 0   ;;  %v5992_v1 = vld [vmem:[#allocation5 + $0xe4] ss:$16 sps:$4 sm:$0xff]   ;;  %v6041_v34 = vld [vmem:[%s6648_s1 + $0x8] sm:$0xff]  }
  0x1c   :  { %334 = vmatprep.mubr.bf16.mxu0 %v6432_v0  ;;  %447 = vmatprep.mubr.bf16.mxu1 %v6432_v0  ;;  %v5994_v2 = vld [vmem:[#allocation5 + $0xec] ss:$16 sps:$4 sm:$0xff]   ;;  %v5996_v3 = vld [vmem:[#allocation5 + $0xe0] ss:$16 sps:$4 sm:$0xff]   ;;  %v5997_v4 = vld [vmem:[#allocation5 + $0xe8] ss:$16 sps:$4 sm:$0xff]  }
  0x1d   :  { %302 = vmatprep.subr.bf16.mxu0 %v5992_v1  ;;  %415 = vmatprep.subr.bf16.mxu1 %v5994_v2  ;;  %v5998_v5 = vld [vmem:[#allocation5 + $0xc4] ss:$16 sps:$4 sm:$0xff]   ;;  %v6000_v6 = vld [vmem:[#allocation5 + $0xcc] ss:$16 sps:$4 sm:$0xff]   ;;  %v6002_v7 = vld [vmem:[#allocation5 + $0xc0] ss:$16 sps:$4 sm:$0xff]  }
  0x1e   :  { %303 = vmatpush1.bf16.msra.mxu0 %v5996_v3  ;;  %416 = vmatpush1.bf16.msra.mxu1 %v5997_v4  ;;  %v6003_v8 = vld [vmem:[#allocation5 + $0xc8] ss:$16 sps:$4 sm:$0xff]   ;;  %v6004_v9 = vld [vmem:[#allocation5 + $0xa4] ss:$16 sps:$4 sm:$0xff]   ;;  %v6006_v10 = vld [vmem:[#allocation5 + $0xac] ss:$16 sps:$4 sm:$0xff]  }
  0x1f   :  { %304 = vmatprep.subr.bf16.mxu0 %v5998_v5  ;;  %417 = vmatprep.subr.bf16.mxu1 %v6000_v6  ;;  %v6008_v11 = vld [vmem:[#allocation5 + $0xa0] ss:$16 sps:$4 sm:$0xff]   ;;  %v6009_v12 = vld [vmem:[#allocation5 + $0xa8] ss:$16 sps:$4 sm:$0xff]   ;;  %v6010_v13 = vld [vmem:[#allocation5 + $0x84] ss:$16 sps:$4 sm:$0xff]  }
  0x20   :  { %v6012_v14 = vld [vmem:[#allocation5 + $0x8c] ss:$16 sps:$4 sm:$0xff]   ;;  %v6014_v15 = vld [vmem:[#allocation5 + $0x80] ss:$16 sps:$4 sm:$0xff]   ;;  %v6015_v16 = vld [vmem:[#allocation5 + $0x88] ss:$16 sps:$4 sm:$0xff]  }
  0x21   :  { %v6016_v17 = vld [vmem:[#allocation5 + $0x64] ss:$16 sps:$4 sm:$0xff]   ;;  %v6018_v18 = vld [vmem:[#allocation5 + $0x6c] ss:$16 sps:$4 sm:$0xff]   ;;  %v6020_v19 = vld [vmem:[#allocation5 + $0x60] ss:$16 sps:$4 sm:$0xff]  }
  0x22   :  { %305 = vmatpush1.bf16.msra.mxu0 %v6002_v7  ;;  %418 = vmatpush1.bf16.msra.mxu1 %v6003_v8  ;;  %v6021_v20 = vld [vmem:[#allocation5 + $0x68] ss:$16 sps:$4 sm:$0xff]   ;;  %v6022_v21 = vld [vmem:[#allocation5 + $0x44] ss:$16 sps:$4 sm:$0xff]   ;;  %v6024_v22 = vld [vmem:[#allocation5 + $0x4c] ss:$16 sps:$4 sm:$0xff]  }
  0x23   :  { %306 = vmatprep.subr.bf16.mxu0 %v6004_v9  ;;  %419 = vmatprep.subr.bf16.mxu1 %v6006_v10  ;;  %v6026_v23 = vld [vmem:[#allocation5 + $0x40] ss:$16 sps:$4 sm:$0xff]   ;;  %v6027_v24 = vld [vmem:[#allocation5 + $0x48] ss:$16 sps:$4 sm:$0xff]   ;;  %v6028_v25 = vld [vmem:[#allocation5 + $0x24] ss:$16 sps:$4 sm:$0xff]  }
  0x24   :  { %v6030_v26 = vld [vmem:[#allocation5 + $0x2c] ss:$16 sps:$4 sm:$0xff]   ;;  %v6032_v27 = vld [vmem:[#allocation5 + $0x20] ss:$16 sps:$4 sm:$0xff]   ;;  %v6033_v28 = vld [vmem:[#allocation5 + $0x28] ss:$16 sps:$4 sm:$0xff]  }
  0x25   :  { %v6034_v29 = vld [vmem:[#allocation5 + $0x4] ss:$16 sps:$4 sm:$0xff]   ;;  %v6036_v30 = vld [vmem:[#allocation5 + $0xc] ss:$16 sps:$4 sm:$0xff]   ;;  %v6038_v31 = vld [vmem:[#allocation5] ss:$16 sps:$4 sm:$0xff]  }
  0x26   :  { %307 = vmatpush1.bf16.msra.mxu0 %v6008_v11  ;;  %420 = vmatpush1.bf16.msra.mxu1 %v6009_v12  ;;  %v6039_v32 = vld [vmem:[#allocation5 + $0x8] ss:$16 sps:$4 sm:$0xff]   ;;  %v6040_v33 = vld [vmem:[%s6648_s1] sm:$0xff]   ;;  %v6042_v35 = vld [vmem:[%s6648_s1 + $0x10] sm:$0xff]  }
  0x27   :  { %308 = vmatprep.subr.bf16.mxu0 %v6010_v13  ;;  %421 = vmatprep.subr.bf16.mxu1 %v6012_v14  ;;  %v6043_v36 = vld [vmem:[%s6648_s1 + $0x18] sm:$0xff]   ;;  %v6044_v37 = vld [vmem:[%s6648_s1 + $0x20] sm:$0xff]   ;;  %v6045_v38 = vld [vmem:[%s6648_s1 + $0x28] sm:$0xff]  }
  0x28   :  { %v6046_v39 = vld [vmem:[%s6648_s1 + $0x30] sm:$0xff]   ;;  %v6047_v40 = vld [vmem:[%s6648_s1 + $0x38] sm:$0xff]  }
  0x29   :  { %v6082_v41 = vld [vmem:[#allocation3 + $0x4] ss:$16 sps:$4 sm:$0xff]   ;;  %v6085_v42 = vld [vmem:[#allocation3 + $0xc] ss:$16 sps:$4 sm:$0xff]  }
  0x2a   :  { %309 = vmatpush1.bf16.msra.mxu0 %v6014_v15  ;;  %422 = vmatpush1.bf16.msra.mxu1 %v6015_v16 }
  0x2b   :  { %310 = vmatprep.subr.bf16.mxu0 %v6016_v17  ;;  %423 = vmatprep.subr.bf16.mxu1 %v6018_v18 }
  0x2e   :  { %311 = vmatpush1.bf16.msra.mxu0 %v6020_v19  ;;  %424 = vmatpush1.bf16.msra.mxu1 %v6021_v20 }
  0x2f   :  { %312 = vmatprep.subr.bf16.mxu0 %v6022_v21  ;;  %425 = vmatprep.subr.bf16.mxu1 %v6024_v22 }
  0x32   :  { %313 = vmatpush1.bf16.msra.mxu0 %v6026_v23  ;;  %426 = vmatpush1.bf16.msra.mxu1 %v6027_v24 }
  0x33   :  { %314 = vmatprep.subr.bf16.mxu0 %v6028_v25  ;;  %427 = vmatprep.subr.bf16.mxu1 %v6030_v26 }
  0x36   :  { %315 = vmatpush1.bf16.msra.mxu0 %v6032_v27  ;;  %428 = vmatpush1.bf16.msra.mxu1 %v6033_v28 }
  0x37   :  { %316 = vmatprep.subr.bf16.mxu0 %v6034_v29  ;;  %429 = vmatprep.subr.bf16.mxu1 %v6036_v30 }
  0x3a   :  { %317 = vmatpush1.bf16.msra.mxu0 %v6038_v31  ;;  %430 = vmatpush1.bf16.msra.mxu1 %v6039_v32 }
  0x3d   :  { %335 = vmatmul.mubr.bf16.vlgmr.msra.gmra.mxu0 %v6040_v33  ;;  %448 = vmatmul.mubr.bf16.vlgmr.msra.gmra.mxu1 %v6040_v33 }
  0x3e   :  { %344 = vmatprep.mubr.bf16.mxu0 %v6432_v0  ;;  %457 = vmatprep.mubr.bf16.mxu1 %v6432_v0 }
  0x45   :  { %345 = vmatmul.mubr.bf16.gmra.mxu0 %v6041_v34  ;;  %458 = vmatmul.mubr.bf16.gmra.mxu1 %v6041_v34 }
  0x46   :  { %354 = vmatprep.mubr.bf16.mxu0 %v6432_v0  ;;  %467 = vmatprep.mubr.bf16.mxu1 %v6432_v0 }
  0x4d   :  { %355 = vmatmul.mubr.bf16.gmra.mxu0 %v6042_v35  ;;  %468 = vmatmul.mubr.bf16.gmra.mxu1 %v6042_v35 }
  0x4e   :  { %364 = vmatprep.mubr.bf16.mxu0 %v6432_v0  ;;  %477 = vmatprep.mubr.bf16.mxu1 %v6432_v0 }
  0x55   :  { %365 = vmatmul.mubr.bf16.gmra.mxu0 %v6043_v36  ;;  %478 = vmatmul.mubr.bf16.gmra.mxu1 %v6043_v36 }
  0x56   :  { %374 = vmatprep.mubr.bf16.mxu0 %v6432_v0  ;;  %487 = vmatprep.mubr.bf16.mxu1 %v6432_v0 }
  0x5d   :  { %375 = vmatmul.mubr.bf16.gmra.mxu0 %v6044_v37  ;;  %488 = vmatmul.mubr.bf16.gmra.mxu1 %v6044_v37 }
  0x5e   :  { %384 = vmatprep.mubr.bf16.mxu0 %v6432_v0  ;;  %497 = vmatprep.mubr.bf16.mxu1 %v6432_v0 }
  0x65   :  { %385 = vmatmul.mubr.bf16.gmra.mxu0 %v6045_v38  ;;  %498 = vmatmul.mubr.bf16.gmra.mxu1 %v6045_v38 }
  0x66   :  { %394 = vmatprep.mubr.bf16.mxu0 %v6432_v0  ;;  %507 = vmatprep.mubr.bf16.mxu1 %v6432_v0 }
  0x6d   :  { %395 = vmatmul.mubr.bf16.gmra.mxu0 %v6046_v39  ;;  %508 = vmatmul.mubr.bf16.gmra.mxu1 %v6046_v39 }
  0x6e   :  { %404 = vmatprep.mubr.bf16.mxu0 %v6432_v0  ;;  %517 = vmatprep.mubr.bf16.mxu1 %v6432_v0 }
  0x75   :  { %405 = vmatmul.mubr.bf16.gmra.mxu0 %v6047_v40  ;;  %518 = vmatmul.mubr.bf16.gmra.mxu1 %v6047_v40 }
  0x76   :  { %1335 = vmatprep.mubr.bf16.mxu0 %v6082_v41  ;;  %1432 = vmatprep.mubr.bf16.mxu1 %v6085_v42 }
  0xfd   :  { %v336_v43 = vpop.f32.mrf.mxu0  ;;  %v449_v44 = vpop.f32.mrf.mxu1 }
  0xff   :  { %v338_v45 = vpop.f32.mrf.mxu0  ;;  %v451_v46 = vpop.f32.mrf.mxu1 }
 0x101   :  { %v340_v47 = vpop.f32.mrf.mxu0  ;;  %v453_v48 = vpop.f32.mrf.mxu1 }
 0x102   :  { %v5033_v49 = vpack.c.bf16 %v340_v47, %v336_v43  ;;  %v5113_v50 = vpack.c.bf16 %v453_v48, %v449_v44 }
 0x103   :  { %v342_v51 = vpop.f32.mrf.mxu0  ;;  %v455_v52 = vpop.f32.mrf.mxu1 }
 0x104   :  { %5034 = vst [vmem:[#allocation2] sm:$0xff] %v5033_v49   ;;  %5525 = vst [vmem:[#allocation2 + $0x80] sm:$0xff] %v5113_v50   ;;  %v5073_v53 = vpack.c.bf16 %v342_v51, %v338_v45  ;;  %v5153_v54 = vpack.c.bf16 %v455_v52, %v451_v46 }
 0x105   :  { %v346_v55 = vpop.f32.mrf.mxu0  ;;  %v459_v56 = vpop.f32.mrf.mxu1 }
 0x106   :  { %5517 = vst [vmem:[#allocation2 + $0x40] sm:$0xff] %v5073_v53   ;;  %5533 = vst [vmem:[#allocation2 + $0xc0] sm:$0xff] %v5153_v54  }
 0x107   :  { %v348_v57 = vpop.f32.mrf.mxu0  ;;  %v461_v58 = vpop.f32.mrf.mxu1 }
 0x109   :  { %v350_v59 = vpop.f32.mrf.mxu0  ;;  %v463_v60 = vpop.f32.mrf.mxu1 }
 0x10a   :  { %v5038_v61 = vpack.c.bf16 %v350_v59, %v346_v55  ;;  %v5118_v62 = vpack.c.bf16 %v463_v60, %v459_v56 }
 0x10b   :  { %v352_v63 = vpop.f32.mrf.mxu0  ;;  %v465_v1 = vpop.f32.mrf.mxu1 }
 0x10c   :  { %5510 = vst [vmem:[#allocation2 + $0x8] sm:$0xff] %v5038_v61   ;;  %5526 = vst [vmem:[#allocation2 + $0x88] sm:$0xff] %v5118_v62   ;;  %v5078_v2 = vpack.c.bf16 %v352_v63, %v348_v57  ;;  %v5158_v3 = vpack.c.bf16 %v465_v1, %v461_v58 }
 0x10d   :  { %v356_v4 = vpop.f32.mrf.mxu0  ;;  %v469_v5 = vpop.f32.mrf.mxu1 }
 0x10e   :  { %5518 = vst [vmem:[#allocation2 + $0x48] sm:$0xff] %v5078_v2   ;;  %5534 = vst [vmem:[#allocation2 + $0xc8] sm:$0xff] %v5158_v3  }
 0x10f   :  { %v358_v6 = vpop.f32.mrf.mxu0  ;;  %v471_v7 = vpop.f32.mrf.mxu1 }
 0x111   :  { %v360_v8 = vpop.f32.mrf.mxu0  ;;  %v473_v9 = vpop.f32.mrf.mxu1 }
 0x112   :  { %v5043_v10 = vpack.c.bf16 %v360_v8, %v356_v4  ;;  %v5123_v11 = vpack.c.bf16 %v473_v9, %v469_v5 }
 0x113   :  { %v362_v12 = vpop.f32.mrf.mxu0  ;;  %v475_v13 = vpop.f32.mrf.mxu1 }
 0x114   :  { %5511 = vst [vmem:[#allocation2 + $0x10] sm:$0xff] %v5043_v10   ;;  %5527 = vst [vmem:[#allocation2 + $0x90] sm:$0xff] %v5123_v11   ;;  %v5083_v14 = vpack.c.bf16 %v362_v12, %v358_v6  ;;  %v5163_v15 = vpack.c.bf16 %v475_v13, %v471_v7 }
 0x115   :  { %v366_v16 = vpop.f32.mrf.mxu0  ;;  %v479_v17 = vpop.f32.mrf.mxu1 }
 0x116   :  { %5519 = vst [vmem:[#allocation2 + $0x50] sm:$0xff] %v5083_v14   ;;  %5535 = vst [vmem:[#allocation2 + $0xd0] sm:$0xff] %v5163_v15  }
 0x117   :  { %v368_v18 = vpop.f32.mrf.mxu0  ;;  %v481_v19 = vpop.f32.mrf.mxu1 }
 0x119   :  { %v370_v20 = vpop.f32.mrf.mxu0  ;;  %v483_v21 = vpop.f32.mrf.mxu1 }
 0x11a   :  { %v5048_v22 = vpack.c.bf16 %v370_v20, %v366_v16  ;;  %v5128_v23 = vpack.c.bf16 %v483_v21, %v479_v17 }
 0x11b   :  { %v372_v24 = vpop.f32.mrf.mxu0  ;;  %v485_v25 = vpop.f32.mrf.mxu1 }
 0x11c   :  { %5512 = vst [vmem:[#allocation2 + $0x18] sm:$0xff] %v5048_v22   ;;  %5528 = vst [vmem:[#allocation2 + $0x98] sm:$0xff] %v5128_v23   ;;  %v5088_v26 = vpack.c.bf16 %v372_v24, %v368_v18  ;;  %v5168_v27 = vpack.c.bf16 %v485_v25, %v481_v19 }
 0x11d   :  { %v376_v28 = vpop.f32.mrf.mxu0  ;;  %v489_v29 = vpop.f32.mrf.mxu1 }
 0x11e   :  { %5520 = vst [vmem:[#allocation2 + $0x58] sm:$0xff] %v5088_v26   ;;  %5536 = vst [vmem:[#allocation2 + $0xd8] sm:$0xff] %v5168_v27  }
 0x11f   :  { %v378_v30 = vpop.f32.mrf.mxu0  ;;  %v491_v31 = vpop.f32.mrf.mxu1 }
 0x121   :  { %v380_v32 = vpop.f32.mrf.mxu0  ;;  %v493_v33 = vpop.f32.mrf.mxu1 }
 0x122   :  { %v5053_v34 = vpack.c.bf16 %v380_v32, %v376_v28  ;;  %v5133_v35 = vpack.c.bf16 %v493_v33, %v489_v29  ;;  %v6068_v33 = vld [vmem:[#allocation2 + $0x50] sm:$0xff]  }
 0x123   :  { %v382_v36 = vpop.f32.mrf.mxu0  ;;  %v495_v37 = vpop.f32.mrf.mxu1  ;;  %v6067_v32 = vld [vmem:[#allocation2 + $0x98] sm:$0xff]  }
 0x124   :  { %5513 = vst [vmem:[#allocation2 + $0x20] sm:$0xff] %v5053_v34   ;;  %5529 = vst [vmem:[#allocation2 + $0xa0] sm:$0xff] %v5133_v35   ;;  %v5093_v38 = vpack.c.bf16 %v382_v36, %v378_v30  ;;  %v5173_v39 = vpack.c.bf16 %v495_v37, %v491_v31  ;;  %v6066_v31 = vld [vmem:[#allocation2 + $0x18] sm:$0xff]   ;;  %v6069_v34 = vld [vmem:[#allocation2 + $0xd0] sm:$0xff]  }
 0x125   :  { %v386_v40 = vpop.f32.mrf.mxu0  ;;  %v499_v41 = vpop.f32.mrf.mxu1  ;;  %v6064_v29 = vld [vmem:[#allocation2 + $0x58] sm:$0xff]   ;;  %v6070_v35 = vld [vmem:[#allocation2 + $0x10] sm:$0xff]   ;;  %v6072_v37 = vld [vmem:[#allocation2 + $0x48] sm:$0xff]  }
 0x126   :  { %5521 = vst [vmem:[#allocation2 + $0x60] sm:$0xff] %v5093_v38   ;;  %5537 = vst [vmem:[#allocation2 + $0xe0] sm:$0xff] %v5173_v39   ;;  %v6065_v30 = vld [vmem:[#allocation2 + $0xd8] sm:$0xff]   ;;  %v6071_v36 = vld [vmem:[#allocation2 + $0x90] sm:$0xff]  }
 0x127   :  { %v388_v42 = vpop.f32.mrf.mxu0  ;;  %v501_v43 = vpop.f32.mrf.mxu1  ;;  %v6073_v38 = vld [vmem:[#allocation2 + $0xc8] sm:$0xff]  }
 0x128   :  { %v6074_v39 = vld [vmem:[#allocation2 + $0x8] sm:$0xff]  }
 0x129   :  { %v390_v44 = vpop.f32.mrf.mxu0  ;;  %v503_v45 = vpop.f32.mrf.mxu1 }
 0x12a   :  { %v5058_v46 = vpack.c.bf16 %v390_v44, %v386_v40  ;;  %v5138_v47 = vpack.c.bf16 %v503_v45, %v499_v41  ;;  %v6075_v40 = vld [vmem:[#allocation2 + $0x88] sm:$0xff]   ;;  %v6076_v41 = vld [vmem:[#allocation2 + $0x40] sm:$0xff]  }
 0x12b   :  { %v392_v48 = vpop.f32.mrf.mxu0  ;;  %v505_v49 = vpop.f32.mrf.mxu1  ;;  %v6062_v27 = vld [vmem:[#allocation2 + $0x20] sm:$0xff]   ;;  %v6133_v45 = vld [vmem:[#allocation5 + $0x1ec] ss:$16 sps:$4 sm:$0xff]  }
 0x12c   :  { %5514 = vst [vmem:[#allocation2 + $0x28] sm:$0xff] %v5058_v46   ;;  %5530 = vst [vmem:[#allocation2 + $0xa8] sm:$0xff] %v5138_v47   ;;  %v5098_v50 = vpack.c.bf16 %v392_v48, %v388_v42  ;;  %v5178_v51 = vpack.c.bf16 %v505_v49, %v501_v43  ;;  %v6063_v28 = vld [vmem:[#allocation2 + $0xa0] sm:$0xff]   ;;  %v6083_v48 = vld [vmem:[#allocation3 + $0x8] ss:$16 sps:$4 sm:$0xff]  }
 0x12d   :  { %v396_v52 = vpop.f32.mrf.mxu0  ;;  %v509_v53 = vpop.f32.mrf.mxu1  ;;  %v6060_v25 = vld [vmem:[#allocation2 + $0x60] sm:$0xff]  }
 0x12e   :  { %5522 = vst [vmem:[#allocation2 + $0x68] sm:$0xff] %v5098_v50   ;;  %5538 = vst [vmem:[#allocation2 + $0xe8] sm:$0xff] %v5178_v51   ;;  %v6061_v26 = vld [vmem:[#allocation2 + $0xe0] sm:$0xff]   ;;  %v6088_v50 = vld [vmem:[#allocation3 + $0x2c] ss:$16 sps:$4 sm:$0xff]  }
 0x12f   :  { %v398_v54 = vpop.f32.mrf.mxu0  ;;  %v511_v55 = vpop.f32.mrf.mxu1  ;;  %v6077_v42 = vld [vmem:[#allocation2 + $0xc0] sm:$0xff]  }
 0x130   :  { %v6130_v43 = vld [vmem:[#allocation5 + $0x1e4] ss:$16 sps:$4 sm:$0xff]   ;;  %v6080_v47 = vld [vmem:[#allocation3] ss:$16 sps:$4 sm:$0xff]  }
 0x131   :  { %v400_v56 = vpop.f32.mrf.mxu0  ;;  %v513_v57 = vpop.f32.mrf.mxu1  ;;  %v6078_v44 = vld [vmem:[#allocation2] sm:$0xff]  }
 0x132   :  { %v5063_v58 = vpack.c.bf16 %v400_v56, %v396_v52  ;;  %v5143_v59 = vpack.c.bf16 %v513_v57, %v509_v53  ;;  %v6079_v46 = vld [vmem:[#allocation2 + $0x80] sm:$0xff]   ;;  %v6131_v52 = vld [vmem:[#allocation5 + $0x1e8] ss:$16 sps:$4 sm:$0xff]  }
 0x133   :  { %v402_v60 = vpop.f32.mrf.mxu0  ;;  %v515_v61 = vpop.f32.mrf.mxu1  ;;  %v6058_v23 = vld [vmem:[#allocation2 + $0x28] sm:$0xff]   ;;  %v6086_v49 = vld [vmem:[#allocation3 + $0x24] ss:$16 sps:$4 sm:$0xff]   ;;  %v6128_v51 = vld [vmem:[#allocation5 + $0x1e0] ss:$16 sps:$4 sm:$0xff]  }
 0x134   :  { %5515 = vst [vmem:[#allocation2 + $0x30] sm:$0xff] %v5063_v58   ;;  %5531 = vst [vmem:[#allocation2 + $0xb0] sm:$0xff] %v5143_v59   ;;  %v5103_v62 = vpack.c.bf16 %v402_v60, %v398_v54  ;;  %v5183_v63 = vpack.c.bf16 %v515_v61, %v511_v55  ;;  %v6059_v24 = vld [vmem:[#allocation2 + $0xa8] sm:$0xff]   ;;  %v6136_v53 = vld [vmem:[#allocation5 + $0x1c4] ss:$16 sps:$4 sm:$0xff]  }
 0x135   :  { %v406_v1 = vpop.f32.mrf.mxu0  ;;  %v519_v2 = vpop.f32.mrf.mxu1  ;;  %v6056_v21 = vld [vmem:[#allocation2 + $0x68] sm:$0xff]   ;;  %v6134_v55 = vld [vmem:[#allocation5 + $0x1c0] ss:$16 sps:$4 sm:$0xff]   ;;  %v6142_v57 = vld [vmem:[#allocation5 + $0x1a4] ss:$16 sps:$4 sm:$0xff]  }
 0x136   :  { %5523 = vst [vmem:[#allocation2 + $0x70] sm:$0xff] %v5103_v62   ;;  %5539 = vst [vmem:[#allocation2 + $0xf0] sm:$0xff] %v5183_v63   ;;  %v6057_v22 = vld [vmem:[#allocation2 + $0xe8] sm:$0xff]   ;;  %v6090_v58 = vld [vmem:[#allocation3 + $0x20] ss:$16 sps:$4 sm:$0xff]  }
 0x137   :  { %v408_v3 = vpop.f32.mrf.mxu0  ;;  %v521_v4 = vpop.f32.mrf.mxu1  ;;  %v6139_v54 = vld [vmem:[#allocation5 + $0x1cc] ss:$16 sps:$4 sm:$0xff]   ;;  %v6137_v56 = vld [vmem:[#allocation5 + $0x1c8] ss:$16 sps:$4 sm:$0xff]   ;;  %v6092_v61 = vld [vmem:[#allocation3 + $0x44] ss:$16 sps:$4 sm:$0xff]  }
 0x138   :  { %v6145_v59 = vld [vmem:[#allocation5 + $0x1ac] ss:$16 sps:$4 sm:$0xff]   ;;  %v6091_v60 = vld [vmem:[#allocation3 + $0x28] ss:$16 sps:$4 sm:$0xff]   ;;  %v6140_v63 = vld [vmem:[#allocation5 + $0x1a0] ss:$16 sps:$4 sm:$0xff]  }
 0x139   :  { %v410_v5 = vpop.f32.mrf.mxu0  ;;  %v523_v6 = vpop.f32.mrf.mxu1  ;;  %v6094_v62 = vld [vmem:[#allocation3 + $0x4c] ss:$16 sps:$4 sm:$0xff]  }
 0x13a   :  { %v5068_v7 = vpack.c.bf16 %v410_v5, %v406_v1  ;;  %v5148_v8 = vpack.c.bf16 %v523_v6, %v519_v2  ;;  %v6143_v1 = vld [vmem:[#allocation5 + $0x1a8] ss:$16 sps:$4 sm:$0xff]   ;;  %v6148_v2 = vld [vmem:[#allocation5 + $0x184] ss:$16 sps:$4 sm:$0xff]   ;;  %v6096_v6 = vld [vmem:[#allocation3 + $0x40] ss:$16 sps:$4 sm:$0xff]  }
 0x13b   :  { %v412_v9 = vpop.f32.mrf.mxu0  ;;  %v525_v10 = vpop.f32.mrf.mxu1  ;;  %v6054_v19 = vld [vmem:[#allocation2 + $0x30] sm:$0xff]   ;;  %v6149_v5 = vld [vmem:[#allocation5 + $0x188] ss:$16 sps:$4 sm:$0xff]  }
 0x13c   :  { %5516 = vst [vmem:[#allocation2 + $0x38] sm:$0xff] %v5068_v7   ;;  %5532 = vst [vmem:[#allocation2 + $0xb8] sm:$0xff] %v5148_v8   ;;  %v5108_v11 = vpack.c.bf16 %v412_v9, %v408_v3  ;;  %v5188_v12 = vpack.c.bf16 %v525_v10, %v521_v4  ;;  %v6055_v20 = vld [vmem:[#allocation2 + $0xb0] sm:$0xff]   ;;  %v6151_v3 = vld [vmem:[#allocation5 + $0x18c] ss:$16 sps:$4 sm:$0xff]  }
 0x13d   :  { %v6052_v17 = vld [vmem:[#allocation2 + $0x70] sm:$0xff]   ;;  %v6097_v7 = vld [vmem:[#allocation3 + $0x48] ss:$16 sps:$4 sm:$0xff]   ;;  %v6100_v9 = vld [vmem:[#allocation3 + $0x6c] ss:$16 sps:$4 sm:$0xff]  }
 0x13e   :  { %5524 = vst [vmem:[#allocation2 + $0x78] sm:$0xff] %v5108_v11   ;;  %5540 = vst [vmem:[#allocation2 + $0xf8] sm:$0xff] %v5188_v12   ;;  %v6053_v18 = vld [vmem:[#allocation2 + $0xf0] sm:$0xff]   ;;  %v6103_v11 = vld [vmem:[#allocation3 + $0x68] ss:$16 sps:$4 sm:$0xff]  }
 0x13f   :  { %v6146_v4 = vld [vmem:[#allocation5 + $0x180] ss:$16 sps:$4 sm:$0xff]   ;;  %v6098_v8 = vld [vmem:[#allocation3 + $0x64] ss:$16 sps:$4 sm:$0xff]  }
 0x140   :  { %v6102_v10 = vld [vmem:[#allocation3 + $0x60] ss:$16 sps:$4 sm:$0xff]   ;;  %v6104_v12 = vld [vmem:[#allocation3 + $0x84] ss:$16 sps:$4 sm:$0xff]  }
 0x143   :  { %v6050_v13 = vld [vmem:[#allocation2 + $0x38] sm:$0xff]  }
 0x144   :  { %v6051_v16 = vld [vmem:[#allocation2 + $0xb8] sm:$0xff]  }
 0x145   :  { %v6048_v14 = vld [vmem:[#allocation2 + $0x78] sm:$0xff]  }
 0x146   :  { %v6049_v15 = vld [vmem:[#allocation2 + $0xf8] sm:$0xff]   ;;  %5603 = vmatprep.subr.bf16.mxu0 %v6048_v14  ;;  %v6108_v14 = vld [vmem:[#allocation3 + $0x80] ss:$16 sps:$4 sm:$0xff]  }
 0x147   :  { %5667 = vmatprep.subr.bf16.mxu1 %v6049_v15  ;;  %5604 = vmatpush3.bf16.msra.mxu0 %v6050_v13  ;;  %v6106_v13 = vld [vmem:[#allocation3 + $0x8c] ss:$16 sps:$4 sm:$0xff]   ;;  %v6109_v15 = vld [vmem:[#allocation3 + $0x88] ss:$16 sps:$4 sm:$0xff]  }
 0x148   :  { %5668 = vmatpush3.bf16.msra.mxu1 %v6051_v16  ;;  %5605 = vmatprep.subr.bf16.mxu0 %v6052_v17  ;;  %v6110_v16 = vld [vmem:[#allocation3 + $0xa4] ss:$16 sps:$4 sm:$0xff]   ;;  %v6112_v17 = vld [vmem:[#allocation3 + $0xac] ss:$16 sps:$4 sm:$0xff]  }
 0x149   :  { %5669 = vmatprep.subr.bf16.mxu1 %v6053_v18  ;;  %v6114_v18 = vld [vmem:[#allocation3 + $0xa0] ss:$16 sps:$4 sm:$0xff]  }
 0x14b   :  { %5606 = vmatpush3.bf16.msra.mxu0 %v6054_v19  ;;  %v6115_v19 = vld [vmem:[#allocation3 + $0xa8] ss:$16 sps:$4 sm:$0xff]  }
 0x14c   :  { %5670 = vmatpush3.bf16.msra.mxu1 %v6055_v20  ;;  %5607 = vmatprep.subr.bf16.mxu0 %v6056_v21  ;;  %v6116_v20 = vld [vmem:[#allocation3 + $0xc4] ss:$16 sps:$4 sm:$0xff]   ;;  %v6118_v21 = vld [vmem:[#allocation3 + $0xcc] ss:$16 sps:$4 sm:$0xff]  }
 0x14d   :  { %5671 = vmatprep.subr.bf16.mxu1 %v6057_v22  ;;  %v6120_v22 = vld [vmem:[#allocation3 + $0xc0] ss:$16 sps:$4 sm:$0xff]  }
 0x14f   :  { %5608 = vmatpush3.bf16.msra.mxu0 %v6058_v23  ;;  %v6121_v23 = vld [vmem:[#allocation3 + $0xc8] ss:$16 sps:$4 sm:$0xff]  }
 0x150   :  { %5672 = vmatpush3.bf16.msra.mxu1 %v6059_v24  ;;  %5609 = vmatprep.subr.bf16.mxu0 %v6060_v25  ;;  %v6122_v24 = vld [vmem:[#allocation3 + $0xe4] ss:$16 sps:$4 sm:$0xff]   ;;  %v6124_v25 = vld [vmem:[#allocation3 + $0xec] ss:$16 sps:$4 sm:$0xff]  }
 0x151   :  { %5673 = vmatprep.subr.bf16.mxu1 %v6061_v26  ;;  %v6126_v26 = vld [vmem:[#allocation3 + $0xe0] ss:$16 sps:$4 sm:$0xff]  }
 0x153   :  { %5610 = vmatpush3.bf16.msra.mxu0 %v6062_v27  ;;  %v6127_v27 = vld [vmem:[#allocation3 + $0xe8] ss:$16 sps:$4 sm:$0xff]  }
 0x154   :  { %5674 = vmatpush3.bf16.msra.mxu1 %v6063_v28  ;;  %5611 = vmatprep.subr.bf16.mxu0 %v6064_v29  ;;  %v6154_v28 = vld [vmem:[#allocation5 + $0x164] ss:$16 sps:$4 sm:$0xff]   ;;  %v6157_v29 = vld [vmem:[#allocation5 + $0x16c] ss:$16 sps:$4 sm:$0xff]  }
 0x155   :  { %5675 = vmatprep.subr.bf16.mxu1 %v6065_v30  ;;  %v6152_v30 = vld [vmem:[#allocation5 + $0x160] ss:$16 sps:$4 sm:$0xff]  }
 0x157   :  { %5612 = vmatpush3.bf16.msra.mxu0 %v6066_v31  ;;  %v6155_v31 = vld [vmem:[#allocation5 + $0x168] ss:$16 sps:$4 sm:$0xff]  }
 0x158   :  { %5676 = vmatpush3.bf16.msra.mxu1 %v6067_v32  ;;  %5613 = vmatprep.subr.bf16.mxu0 %v6068_v33  ;;  %v6160_v32 = vld [vmem:[#allocation5 + $0x144] ss:$16 sps:$4 sm:$0xff]   ;;  %v6163_v33 = vld [vmem:[#allocation5 + $0x14c] ss:$16 sps:$4 sm:$0xff]  }
 0x159   :  { %5677 = vmatprep.subr.bf16.mxu1 %v6069_v34  ;;  %v6158_v34 = vld [vmem:[#allocation5 + $0x140] ss:$16 sps:$4 sm:$0xff]  }
 0x15b   :  { %5614 = vmatpush3.bf16.msra.mxu0 %v6070_v35  ;;  %v6161_v35 = vld [vmem:[#allocation5 + $0x148] ss:$16 sps:$4 sm:$0xff]  }
 0x15c   :  { %5678 = vmatpush3.bf16.msra.mxu1 %v6071_v36  ;;  %5615 = vmatprep.subr.bf16.mxu0 %v6072_v37  ;;  %v6166_v36 = vld [vmem:[#allocation5 + $0x124] ss:$16 sps:$4 sm:$0xff]   ;;  %v6169_v37 = vld [vmem:[#allocation5 + $0x12c] ss:$16 sps:$4 sm:$0xff]  }
 0x15d   :  { %5679 = vmatprep.subr.bf16.mxu1 %v6073_v38  ;;  %v6164_v38 = vld [vmem:[#allocation5 + $0x120] ss:$16 sps:$4 sm:$0xff]  }
 0x15f   :  { %5616 = vmatpush3.bf16.msra.mxu0 %v6074_v39  ;;  %v6167_v39 = vld [vmem:[#allocation5 + $0x128] ss:$16 sps:$4 sm:$0xff]  }
 0x160   :  { %5680 = vmatpush3.bf16.msra.mxu1 %v6075_v40  ;;  %5617 = vmatprep.subr.bf16.mxu0 %v6076_v41  ;;  %v6172_v40 = vld [vmem:[#allocation5 + $0x104] ss:$16 sps:$4 sm:$0xff]   ;;  %v6175_v41 = vld [vmem:[#allocation5 + $0x10c] ss:$16 sps:$4 sm:$0xff]  }
 0x161   :  { %5681 = vmatprep.subr.bf16.mxu1 %v6077_v42  ;;  %v6170_v42 = vld [vmem:[#allocation5 + $0x100] ss:$16 sps:$4 sm:$0xff]  }
 0x163   :  { %5618 = vmatpush3.bf16.msra.mxu0 %v6078_v44 }
 0x164   :  { %5682 = vmatpush3.bf16.msra.mxu1 %v6079_v46  ;;  %1714 = vmatprep.subr.bf16.mxu0 %v6130_v43  ;;  %v6173_v43 = vld [vmem:[#allocation5 + $0x108] ss:$16 sps:$4 sm:$0xff]   ;;  %v6509_v46 = vld [vmem:[%s6650_s3] ss:$0 sm:$0xff] }
 0x165   :  { %1827 = vmatprep.subr.bf16.mxu1 %v6133_v45 }
 0x166   :  { %1336 = vmatmul.mubr.bf16.vlgmr.msra.gmra.mxu0 %v6080_v47 }
 0x167   :  { %1433 = vmatmul.mubr.bf16.vlgmr.msra.gmra.mxu1 %v6083_v48  ;;  %1343 = vmatprep.mubr.bf16.mxu0 %v6086_v49 }
 0x168   :  { %1440 = vmatprep.mubr.bf16.mxu1 %v6088_v50  ;;  %1715 = vmatpush1.bf16.msra.mxu0 %v6128_v51 }
 0x169   :  { %1828 = vmatpush1.bf16.msra.mxu1 %v6131_v52  ;;  %1716 = vmatprep.subr.bf16.mxu0 %v6136_v53 }
 0x16a   :  { %1829 = vmatprep.subr.bf16.mxu1 %v6139_v54 }
 0x16c   :  { %1717 = vmatpush1.bf16.msra.mxu0 %v6134_v55 }
 0x16d   :  { %1830 = vmatpush1.bf16.msra.mxu1 %v6137_v56  ;;  %1718 = vmatprep.subr.bf16.mxu0 %v6142_v57 }
 0x16e   :  { %1344 = vmatmul.mubr.bf16.gmra.mxu0 %v6090_v58  ;;  %1831 = vmatprep.subr.bf16.mxu1 %v6145_v59 }
 0x16f   :  { %1441 = vmatmul.mubr.bf16.gmra.mxu1 %v6091_v60  ;;  %1351 = vmatprep.mubr.bf16.mxu0 %v6092_v61 }
 0x170   :  { %1448 = vmatprep.mubr.bf16.mxu1 %v6094_v62  ;;  %1719 = vmatpush1.bf16.msra.mxu0 %v6140_v63 }
 0x171   :  { %1832 = vmatpush1.bf16.msra.mxu1 %v6143_v1  ;;  %1720 = vmatprep.subr.bf16.mxu0 %v6148_v2 }
 0x172   :  { %1833 = vmatprep.subr.bf16.mxu1 %v6151_v3 }
 0x174   :  { %1721 = vmatpush1.bf16.msra.mxu0 %v6146_v4 }
 0x175   :  { %1834 = vmatpush1.bf16.msra.mxu1 %v6149_v5  ;;  %1722 = vmatprep.subr.bf16.mxu0 %v6154_v28 }
 0x176   :  { %1352 = vmatmul.mubr.bf16.gmra.mxu0 %v6096_v6  ;;  %1835 = vmatprep.subr.bf16.mxu1 %v6157_v29 }
 0x177   :  { %1449 = vmatmul.mubr.bf16.gmra.mxu1 %v6097_v7  ;;  %1359 = vmatprep.mubr.bf16.mxu0 %v6098_v8 }
 0x178   :  { %1456 = vmatprep.mubr.bf16.mxu1 %v6100_v9  ;;  %1723 = vmatpush1.bf16.msra.mxu0 %v6152_v30 }
 0x179   :  { %1836 = vmatpush1.bf16.msra.mxu1 %v6155_v31  ;;  %1724 = vmatprep.subr.bf16.mxu0 %v6160_v32 }
 0x17a   :  { %1837 = vmatprep.subr.bf16.mxu1 %v6163_v33 }
 0x17c   :  { %1725 = vmatpush1.bf16.msra.mxu0 %v6158_v34 }
 0x17d   :  { %1838 = vmatpush1.bf16.msra.mxu1 %v6161_v35  ;;  %1726 = vmatprep.subr.bf16.mxu0 %v6166_v36 }
 0x17e   :  { %1360 = vmatmul.mubr.bf16.gmra.mxu0 %v6102_v10  ;;  %1839 = vmatprep.subr.bf16.mxu1 %v6169_v37 }
 0x17f   :  { %1457 = vmatmul.mubr.bf16.gmra.mxu1 %v6103_v11  ;;  %1367 = vmatprep.mubr.bf16.mxu0 %v6104_v12 }
 0x180   :  { %1464 = vmatprep.mubr.bf16.mxu1 %v6106_v13  ;;  %1727 = vmatpush1.bf16.msra.mxu0 %v6164_v38 }
 0x181   :  { %1840 = vmatpush1.bf16.msra.mxu1 %v6167_v39  ;;  %1728 = vmatprep.subr.bf16.mxu0 %v6172_v40 }
 0x182   :  { %1841 = vmatprep.subr.bf16.mxu1 %v6175_v41 }
 0x184   :  { %1729 = vmatpush1.bf16.msra.mxu0 %v6170_v42 }
 0x185   :  { %1842 = vmatpush1.bf16.msra.mxu1 %v6173_v43 }
 0x186   :  { %1368 = vmatmul.mubr.bf16.gmra.mxu0 %v6108_v14 }
 0x187   :  { %1465 = vmatmul.mubr.bf16.gmra.mxu1 %v6109_v15  ;;  %1375 = vmatprep.mubr.bf16.mxu0 %v6110_v16 }
 0x188   :  { %1472 = vmatprep.mubr.bf16.mxu1 %v6112_v17 }
 0x18e   :  { %1376 = vmatmul.mubr.bf16.gmra.mxu0 %v6114_v18 }
 0x18f   :  { %1473 = vmatmul.mubr.bf16.gmra.mxu1 %v6115_v19  ;;  %1383 = vmatprep.mubr.bf16.mxu0 %v6116_v20 }
 0x190   :  { %1480 = vmatprep.mubr.bf16.mxu1 %v6118_v21 }
 0x196   :  { %1384 = vmatmul.mubr.bf16.gmra.mxu0 %v6120_v22 }
 0x197   :  { %1481 = vmatmul.mubr.bf16.gmra.mxu1 %v6121_v23  ;;  %1391 = vmatprep.mubr.bf16.mxu0 %v6122_v24 }
 0x198   :  { %1488 = vmatprep.mubr.bf16.mxu1 %v6124_v25 }
 0x19e   :  { %1392 = vmatmul.mubr.bf16.gmra.mxu0 %v6126_v26 }
 0x19f   :  { %1489 = vmatmul.mubr.bf16.gmra.mxu1 %v6127_v27  ;;  %1746 = vmatprep.mubr.bf16.mxu0 %v6432_v0 }
 0x1a0   :  { %1859 = vmatprep.mubr.bf16.mxu1 %v6432_v0 }
 0x226   :  { %v5619_v44 = vpop.f32.mrf.mxu0 }
 0x227   :  { %v5683_v45 = vpop.f32.mrf.mxu1 }
 0x228   :  { %v5620_v47 = vpop.f32.mrf.mxu0 }
 0x229   :  { %v5621_v48 = vadd.f32 %v5620_v47, %v5619_v44  ;;  %v5684_v49 = vpop.f32.mrf.mxu1 }
 0x22a   :  { %v5622_v50 = vpop.f32.mrf.mxu0  ;;  %v5685_v54 = vadd.f32 %v5684_v49, %v5683_v45 }
 0x22b   :  { %v1338_v51 = vadd.f32 %v5621_v48, %v6509_v46  ;;  %v5686_v52 = vpop.f32.mrf.mxu1 }
 0x22c   :  { %v5623_v53 = vpop.f32.mrf.mxu0 }
 0x22d   :  { %v5624_v55 = vadd.f32 %v5623_v53, %v5622_v50  ;;  %v5687_v56 = vpop.f32.mrf.mxu1  ;;  %v1435_v58 = vadd.f32 %v5685_v54, %v1338_v51 }
 0x22e   :  { %v5625_v57 = vpop.f32.mrf.mxu0  ;;  %v5688_v60 = vadd.f32 %v5687_v56, %v5686_v52 }
 0x22f   :  { %v1341_v59 = vadd.f32 %v5624_v55, %v6509_v46  ;;  %v5689_v61 = vpop.f32.mrf.mxu1  ;;  %v1497_v4 = vmax.f32 %v1435_v58, 0.0 }
 0x230   :  { %v5626_v62 = vpop.f32.mrf.mxu0 }
 0x231   :  { %v1438_v63 = vadd.f32 %v5688_v60, %v1341_v59  ;;  %v5627_v1 = vadd.f32 %v5626_v62, %v5625_v57  ;;  %v5690_v2 = vpop.f32.mrf.mxu1 }
 0x232   :  { %v5628_v3 = vpop.f32.mrf.mxu0  ;;  %v5691_v10 = vadd.f32 %v5690_v2, %v5689_v61 }
 0x233   :  { %v1498_v5 = vmax.f32 %v1438_v63, 0.0  ;;  %v1346_v6 = vadd.f32 %v5627_v1, %v6509_v46  ;;  %v5692_v7 = vpop.f32.mrf.mxu1 }
 0x234   :  { %v5629_v8 = vpop.f32.mrf.mxu0 }
 0x235   :  { %v1513_v9 = vpack.c.bf16 %v1498_v5, %v1497_v4  ;;  %v5630_v11 = vadd.f32 %v5629_v8, %v5628_v3  ;;  %v5693_v12 = vpop.f32.mrf.mxu1  ;;  %v1443_v14 = vadd.f32 %v5691_v10, %v1346_v6 }
 0x236   :  { %v5631_v13 = vpop.f32.mrf.mxu0  ;;  %v5694_v16 = vadd.f32 %v5693_v12, %v5692_v7 }
 0x237   :  { %v1349_v15 = vadd.f32 %v5630_v11, %v6509_v46  ;;  %v5695_v17 = vpop.f32.mrf.mxu1  ;;  %1747 = vmatmul.mubr.bf16.vlgmr.msra.gmra.mxu0 %v1513_v9  ;;  %1860 = vmatmul.mubr.bf16.vlgmr.msra.gmra.mxu1 %v1513_v9  ;;  %v1499_v23 = vmax.f32 %v1443_v14, 0.0 }
 0x238   :  { %v5632_v18 = vpop.f32.mrf.mxu0  ;;  %1756 = vmatprep.mubr.bf16.mxu0 %v6432_v0  ;;  %1869 = vmatprep.mubr.bf16.mxu1 %v6432_v0 }
 0x239   :  { %v1446_v19 = vadd.f32 %v5694_v16, %v1349_v15  ;;  %v5633_v20 = vadd.f32 %v5632_v18, %v5631_v13  ;;  %v5696_v21 = vpop.f32.mrf.mxu1 }
 0x23a   :  { %v5634_v22 = vpop.f32.mrf.mxu0  ;;  %v5697_v28 = vadd.f32 %v5696_v21, %v5695_v17 }
 0x23b   :  { %v1500_v24 = vmax.f32 %v1446_v19, 0.0  ;;  %v1354_v25 = vadd.f32 %v5633_v20, %v6509_v46  ;;  %v5698_v26 = vpop.f32.mrf.mxu1 }
 0x23c   :  { %v5635_v27 = vpop.f32.mrf.mxu0 }
 0x23d   :  { %v5636_v29 = vadd.f32 %v5635_v27, %v5634_v22  ;;  %v5699_v30 = vpop.f32.mrf.mxu1  ;;  %v1514_v31 = vpack.c.bf16 %v1500_v24, %v1499_v23  ;;  %v1451_v33 = vadd.f32 %v5697_v28, %v1354_v25 }
 0x23e   :  { %v5637_v32 = vpop.f32.mrf.mxu0  ;;  %v5700_v35 = vadd.f32 %v5699_v30, %v5698_v26 }
 0x23f   :  { %v1357_v34 = vadd.f32 %v5636_v29, %v6509_v46  ;;  %v5701_v36 = vpop.f32.mrf.mxu1  ;;  %1757 = vmatmul.mubr.bf16.gmra.mxu0 %v1514_v31  ;;  %1870 = vmatmul.mubr.bf16.gmra.mxu1 %v1514_v31  ;;  %v1501_v42 = vmax.f32 %v1451_v33, 0.0 }
 0x240   :  { %v5638_v37 = vpop.f32.mrf.mxu0  ;;  %1766 = vmatprep.mubr.bf16.mxu0 %v6432_v0  ;;  %1879 = vmatprep.mubr.bf16.mxu1 %v6432_v0 }
 0x241   :  { %v1454_v38 = vadd.f32 %v5700_v35, %v1357_v34  ;;  %v5639_v39 = vadd.f32 %v5638_v37, %v5637_v32  ;;  %v5702_v40 = vpop.f32.mrf.mxu1 }
 0x242   :  { %v5640_v41 = vpop.f32.mrf.mxu0  ;;  %v5703_v48 = vadd.f32 %v5702_v40, %v5701_v36 }
 0x243   :  { %v1502_v43 = vmax.f32 %v1454_v38, 0.0  ;;  %v1362_v44 = vadd.f32 %v5639_v39, %v6509_v46  ;;  %v5704_v45 = vpop.f32.mrf.mxu1 }
 0x244   :  { %v5641_v47 = vpop.f32.mrf.mxu0 }
 0x245   :  { %v5642_v49 = vadd.f32 %v5641_v47, %v5640_v41  ;;  %v5705_v50 = vpop.f32.mrf.mxu1  ;;  %v1515_v51 = vpack.c.bf16 %v1502_v43, %v1501_v42  ;;  %v1459_v53 = vadd.f32 %v5703_v48, %v1362_v44 }
 0x246   :  { %v5643_v52 = vpop.f32.mrf.mxu0  ;;  %v5706_v55 = vadd.f32 %v5705_v50, %v5704_v45 }
 0x247   :  { %v1365_v54 = vadd.f32 %v5642_v49, %v6509_v46  ;;  %v5707_v56 = vpop.f32.mrf.mxu1  ;;  %1767 = vmatmul.mubr.bf16.gmra.mxu0 %v1515_v51  ;;  %1880 = vmatmul.mubr.bf16.gmra.mxu1 %v1515_v51  ;;  %v1503_v62 = vmax.f32 %v1459_v53, 0.0 }
 0x248   :  { %v5644_v57 = vpop.f32.mrf.mxu0  ;;  %1776 = vmatprep.mubr.bf16.mxu0 %v6432_v0  ;;  %1889 = vmatprep.mubr.bf16.mxu1 %v6432_v0 }
 0x249   :  { %v1462_v58 = vadd.f32 %v5706_v55, %v1365_v54  ;;  %v5645_v59 = vadd.f32 %v5644_v57, %v5643_v52  ;;  %v5708_v60 = vpop.f32.mrf.mxu1 }
 0x24a   :  { %v5646_v61 = vpop.f32.mrf.mxu0  ;;  %v5709_v4 = vadd.f32 %v5708_v60, %v5707_v56 }
 0x24b   :  { %v1504_v63 = vmax.f32 %v1462_v58, 0.0  ;;  %v1370_v1 = vadd.f32 %v5645_v59, %v6509_v46  ;;  %v5710_v2 = vpop.f32.mrf.mxu1 }
 0x24c   :  { %v5647_v3 = vpop.f32.mrf.mxu0 }
 0x24d   :  { %v5648_v5 = vadd.f32 %v5647_v3, %v5646_v61  ;;  %v5711_v6 = vpop.f32.mrf.mxu1  ;;  %v1516_v7 = vpack.c.bf16 %v1504_v63, %v1503_v62  ;;  %v1467_v9 = vadd.f32 %v5709_v4, %v1370_v1 }
 0x24e   :  { %v5649_v8 = vpop.f32.mrf.mxu0  ;;  %v5712_v11 = vadd.f32 %v5711_v6, %v5710_v2 }
 0x24f   :  { %v1373_v10 = vadd.f32 %v5648_v5, %v6509_v46  ;;  %v5713_v12 = vpop.f32.mrf.mxu1  ;;  %1777 = vmatmul.mubr.bf16.gmra.mxu0 %v1516_v7  ;;  %1890 = vmatmul.mubr.bf16.gmra.mxu1 %v1516_v7  ;;  %v1505_v18 = vmax.f32 %v1467_v9, 0.0 }
 0x250   :  { %v5650_v13 = vpop.f32.mrf.mxu0  ;;  %1786 = vmatprep.mubr.bf16.mxu0 %v6432_v0  ;;  %1899 = vmatprep.mubr.bf16.mxu1 %v6432_v0 }
 0x251   :  { %v1470_v14 = vadd.f32 %v5712_v11, %v1373_v10  ;;  %v5651_v15 = vadd.f32 %v5650_v13, %v5649_v8  ;;  %v5714_v16 = vpop.f32.mrf.mxu1  ;;  %v6210_v10 = vld [vmem:[#allocation3 + $0x4] ss:$16 sps:$4 sm:$0xff]   ;;  %v6213_v11 = vld [vmem:[#allocation3 + $0xc] ss:$16 sps:$4 sm:$0xff]  }
 0x252   :  { %v5652_v17 = vpop.f32.mrf.mxu0  ;;  %v5715_v23 = vadd.f32 %v5714_v16, %v5713_v12 }
 0x253   :  { %v1506_v19 = vmax.f32 %v1470_v14, 0.0  ;;  %v1378_v20 = vadd.f32 %v5651_v15, %v6509_v46  ;;  %v5716_v21 = vpop.f32.mrf.mxu1 }
 0x254   :  { %v5653_v22 = vpop.f32.mrf.mxu0 }
 0x255   :  { %v5654_v24 = vadd.f32 %v5653_v22, %v5652_v17  ;;  %v5717_v25 = vpop.f32.mrf.mxu1  ;;  %v1517_v26 = vpack.c.bf16 %v1506_v19, %v1505_v18  ;;  %v1475_v28 = vadd.f32 %v5715_v23, %v1378_v20 }
 0x256   :  { %v5655_v27 = vpop.f32.mrf.mxu0  ;;  %v5718_v30 = vadd.f32 %v5717_v25, %v5716_v21 }
 0x257   :  { %v1381_v29 = vadd.f32 %v5654_v24, %v6509_v46  ;;  %v5719_v31 = vpop.f32.mrf.mxu1  ;;  %1787 = vmatmul.mubr.bf16.gmra.mxu0 %v1517_v26  ;;  %1900 = vmatmul.mubr.bf16.gmra.mxu1 %v1517_v26  ;;  %v1507_v37 = vmax.f32 %v1475_v28, 0.0 }
 0x258   :  { %v5656_v32 = vpop.f32.mrf.mxu0  ;;  %1796 = vmatprep.mubr.bf16.mxu0 %v6432_v0  ;;  %1909 = vmatprep.mubr.bf16.mxu1 %v6432_v0 }
 0x259   :  { %v1478_v33 = vadd.f32 %v5718_v30, %v1381_v29  ;;  %v5657_v34 = vadd.f32 %v5656_v32, %v5655_v27  ;;  %v5720_v35 = vpop.f32.mrf.mxu1 }
 0x25a   :  { %v5658_v36 = vpop.f32.mrf.mxu0  ;;  %v5721_v42 = vadd.f32 %v5720_v35, %v5719_v31 }
 0x25b   :  { %v1508_v38 = vmax.f32 %v1478_v33, 0.0  ;;  %v1386_v39 = vadd.f32 %v5657_v34, %v6509_v46  ;;  %v5722_v40 = vpop.f32.mrf.mxu1 }
 0x25c   :  { %v5659_v41 = vpop.f32.mrf.mxu0 }
 0x25d   :  { %v5660_v43 = vadd.f32 %v5659_v41, %v5658_v36  ;;  %v5723_v44 = vpop.f32.mrf.mxu1  ;;  %v1518_v45 = vpack.c.bf16 %v1508_v38, %v1507_v37  ;;  %v1483_v48 = vadd.f32 %v5721_v42, %v1386_v39 }
 0x25e   :  { %v5661_v47 = vpop.f32.mrf.mxu0  ;;  %v5724_v50 = vadd.f32 %v5723_v44, %v5722_v40 }
 0x25f   :  { %v1389_v49 = vadd.f32 %v5660_v43, %v6509_v46  ;;  %v5725_v51 = vpop.f32.mrf.mxu1  ;;  %1797 = vmatmul.mubr.bf16.gmra.mxu0 %v1518_v45  ;;  %1910 = vmatmul.mubr.bf16.gmra.mxu1 %v1518_v45  ;;  %v1509_v57 = vmax.f32 %v1483_v48, 0.0 }
 0x260   :  { %v5662_v52 = vpop.f32.mrf.mxu0  ;;  %1806 = vmatprep.mubr.bf16.mxu0 %v6432_v0  ;;  %1919 = vmatprep.mubr.bf16.mxu1 %v6432_v0 }
 0x261   :  { %v1486_v53 = vadd.f32 %v5724_v50, %v1389_v49  ;;  %v5663_v54 = vadd.f32 %v5662_v52, %v5661_v47  ;;  %v5726_v55 = vpop.f32.mrf.mxu1 }
 0x262   :  { %v5664_v56 = vpop.f32.mrf.mxu0  ;;  %v5727_v62 = vadd.f32 %v5726_v55, %v5725_v51 }
 0x263   :  { %v1510_v58 = vmax.f32 %v1486_v53, 0.0  ;;  %v1394_v59 = vadd.f32 %v5663_v54, %v6509_v46  ;;  %v5728_v60 = vpop.f32.mrf.mxu1 }
 0x264   :  { %v5665_v61 = vpop.f32.mrf.mxu0 }
 0x265   :  { %v5666_v63 = vadd.f32 %v5665_v61, %v5664_v56  ;;  %v5729_v1 = vpop.f32.mrf.mxu1  ;;  %v1519_v2 = vpack.c.bf16 %v1510_v58, %v1509_v57  ;;  %v1491_v3 = vadd.f32 %v5727_v62, %v1394_v59 }
 0x266   :  { %v5730_v5 = vadd.f32 %v5729_v1, %v5728_v60 }
 0x267   :  { %v1397_v4 = vadd.f32 %v5666_v63, %v6509_v46  ;;  %1807 = vmatmul.mubr.bf16.gmra.mxu0 %v1519_v2  ;;  %1920 = vmatmul.mubr.bf16.gmra.mxu1 %v1519_v2  ;;  %v1511_v7 = vmax.f32 %v1491_v3, 0.0 }
 0x268   :  { %1816 = vmatprep.mubr.bf16.mxu0 %v6432_v0  ;;  %1929 = vmatprep.mubr.bf16.mxu1 %v6432_v0 }
 0x269   :  { %v1494_v6 = vadd.f32 %v5730_v5, %v1397_v4 }
 0x26b   :  { %v1512_v8 = vmax.f32 %v1494_v6, 0.0 }
 0x26d   :  { %v1520_v9 = vpack.c.bf16 %v1512_v8, %v1511_v7 }
 0x26f   :  { %1817 = vmatmul.mubr.bf16.gmra.mxu0 %v1520_v9  ;;  %1930 = vmatmul.mubr.bf16.gmra.mxu1 %v1520_v9 }
 0x270   :  { %2748 = vmatprep.mubr.bf16.mxu0 %v6210_v10  ;;  %2845 = vmatprep.mubr.bf16.mxu1 %v6213_v11 }
 0x2f7   :  { %v1748_v12 = vpop.f32.mrf.mxu0  ;;  %v1861_v13 = vpop.f32.mrf.mxu1 }
 0x2f9   :  { %v1750_v46 = vpop.f32.mrf.mxu0  ;;  %v1863_v14 = vpop.f32.mrf.mxu1 }
 0x2fb   :  { %v1752_v15 = vpop.f32.mrf.mxu0  ;;  %v1865_v16 = vpop.f32.mrf.mxu1 }
 0x2fc   :  { %v5193_v17 = vpack.c.bf16 %v1752_v15, %v1748_v12  ;;  %v5273_v18 = vpack.c.bf16 %v1865_v16, %v1861_v13 }
 0x2fd   :  { %v1754_v19 = vpop.f32.mrf.mxu0  ;;  %v1867_v20 = vpop.f32.mrf.mxu1 }
 0x2fe   :  { %5194 = vst [vmem:[#allocation2] sm:$0xff] %v5193_v17   ;;  %5556 = vst [vmem:[#allocation2 + $0x80] sm:$0xff] %v5273_v18   ;;  %v5233_v21 = vpack.c.bf16 %v1754_v19, %v1750_v46  ;;  %v5313_v22 = vpack.c.bf16 %v1867_v20, %v1863_v14 }
 0x2ff   :  { %v1758_v23 = vpop.f32.mrf.mxu0  ;;  %v1871_v24 = vpop.f32.mrf.mxu1 }
 0x300   :  { %5548 = vst [vmem:[#allocation2 + $0x40] sm:$0xff] %v5233_v21   ;;  %5564 = vst [vmem:[#allocation2 + $0xc0] sm:$0xff] %v5313_v22  }
 0x301   :  { %v1760_v25 = vpop.f32.mrf.mxu0  ;;  %v1873_v26 = vpop.f32.mrf.mxu1 }
 0x303   :  { %v1762_v27 = vpop.f32.mrf.mxu0  ;;  %v1875_v28 = vpop.f32.mrf.mxu1 }
 0x304   :  { %v5198_v29 = vpack.c.bf16 %v1762_v27, %v1758_v23  ;;  %v5278_v30 = vpack.c.bf16 %v1875_v28, %v1871_v24 }
 0x305   :  { %v1764_v31 = vpop.f32.mrf.mxu0  ;;  %v1877_v32 = vpop.f32.mrf.mxu1 }
 0x306   :  { %5541 = vst [vmem:[#allocation2 + $0x8] sm:$0xff] %v5198_v29   ;;  %5557 = vst [vmem:[#allocation2 + $0x88] sm:$0xff] %v5278_v30   ;;  %v5238_v33 = vpack.c.bf16 %v1764_v31, %v1760_v25  ;;  %v5318_v34 = vpack.c.bf16 %v1877_v32, %v1873_v26 }
 0x307   :  { %v1768_v35 = vpop.f32.mrf.mxu0  ;;  %v1881_v36 = vpop.f32.mrf.mxu1 }
 0x308   :  { %5549 = vst [vmem:[#allocation2 + $0x48] sm:$0xff] %v5238_v33   ;;  %5565 = vst [vmem:[#allocation2 + $0xc8] sm:$0xff] %v5318_v34  }
 0x309   :  { %v1770_v37 = vpop.f32.mrf.mxu0  ;;  %v1883_v38 = vpop.f32.mrf.mxu1 }
 0x30b   :  { %v1772_v39 = vpop.f32.mrf.mxu0  ;;  %v1885_v40 = vpop.f32.mrf.mxu1 }
 0x30c   :  { %v5203_v41 = vpack.c.bf16 %v1772_v39, %v1768_v35  ;;  %v5283_v42 = vpack.c.bf16 %v1885_v40, %v1881_v36 }
 0x30d   :  { %v1774_v43 = vpop.f32.mrf.mxu0  ;;  %v1887_v44 = vpop.f32.mrf.mxu1 }
 0x30e   :  { %5542 = vst [vmem:[#allocation2 + $0x10] sm:$0xff] %v5203_v41   ;;  %5558 = vst [vmem:[#allocation2 + $0x90] sm:$0xff] %v5283_v42   ;;  %v5243_v45 = vpack.c.bf16 %v1774_v43, %v1770_v37  ;;  %v5323_v47 = vpack.c.bf16 %v1887_v44, %v1883_v38 }
 0x30f   :  { %v1778_v48 = vpop.f32.mrf.mxu0  ;;  %v1891_v49 = vpop.f32.mrf.mxu1 }
 0x310   :  { %5550 = vst [vmem:[#allocation2 + $0x50] sm:$0xff] %v5243_v45   ;;  %5566 = vst [vmem:[#allocation2 + $0xd0] sm:$0xff] %v5323_v47  }
 0x311   :  { %v1780_v50 = vpop.f32.mrf.mxu0  ;;  %v1893_v51 = vpop.f32.mrf.mxu1 }
 0x313   :  { %v1782_v52 = vpop.f32.mrf.mxu0  ;;  %v1895_v53 = vpop.f32.mrf.mxu1 }
 0x314   :  { %v5208_v54 = vpack.c.bf16 %v1782_v52, %v1778_v48  ;;  %v5288_v55 = vpack.c.bf16 %v1895_v53, %v1891_v49 }
 0x315   :  { %v1784_v56 = vpop.f32.mrf.mxu0  ;;  %v1897_v57 = vpop.f32.mrf.mxu1 }
 0x316   :  { %5543 = vst [vmem:[#allocation2 + $0x18] sm:$0xff] %v5208_v54   ;;  %5559 = vst [vmem:[#allocation2 + $0x98] sm:$0xff] %v5288_v55   ;;  %v5248_v58 = vpack.c.bf16 %v1784_v56, %v1780_v50  ;;  %v5328_v59 = vpack.c.bf16 %v1897_v57, %v1893_v51 }
 0x317   :  { %v1788_v60 = vpop.f32.mrf.mxu0  ;;  %v1901_v61 = vpop.f32.mrf.mxu1 }
 0x318   :  { %5551 = vst [vmem:[#allocation2 + $0x58] sm:$0xff] %v5248_v58   ;;  %5567 = vst [vmem:[#allocation2 + $0xd8] sm:$0xff] %v5328_v59  }
 0x319   :  { %v1790_v62 = vpop.f32.mrf.mxu0  ;;  %v1903_v63 = vpop.f32.mrf.mxu1 }
 0x31b   :  { %v1792_v1 = vpop.f32.mrf.mxu0  ;;  %v1905_v2 = vpop.f32.mrf.mxu1 }
 0x31c   :  { %v5213_v3 = vpack.c.bf16 %v1792_v1, %v1788_v60  ;;  %v5293_v4 = vpack.c.bf16 %v1905_v2, %v1901_v61  ;;  %v6196_v2 = vld [vmem:[#allocation2 + $0x50] sm:$0xff]  }
 0x31d   :  { %v1794_v5 = vpop.f32.mrf.mxu0  ;;  %v1907_v6 = vpop.f32.mrf.mxu1  ;;  %v6195_v1 = vld [vmem:[#allocation2 + $0x98] sm:$0xff]  }
 0x31e   :  { %5544 = vst [vmem:[#allocation2 + $0x20] sm:$0xff] %v5213_v3   ;;  %5560 = vst [vmem:[#allocation2 + $0xa0] sm:$0xff] %v5293_v4   ;;  %v5253_v7 = vpack.c.bf16 %v1794_v5, %v1790_v62  ;;  %v5333_v8 = vpack.c.bf16 %v1907_v6, %v1903_v63  ;;  %v6194_v63 = vld [vmem:[#allocation2 + $0x18] sm:$0xff]   ;;  %v6197_v3 = vld [vmem:[#allocation2 + $0xd0] sm:$0xff]  }
 0x31f   :  { %v1798_v9 = vpop.f32.mrf.mxu0  ;;  %v1911_v10 = vpop.f32.mrf.mxu1  ;;  %v6192_v61 = vld [vmem:[#allocation2 + $0x58] sm:$0xff]   ;;  %v6198_v4 = vld [vmem:[#allocation2 + $0x10] sm:$0xff]   ;;  %v6200_v6 = vld [vmem:[#allocation2 + $0x48] sm:$0xff]  }
 0x320   :  { %5552 = vst [vmem:[#allocation2 + $0x60] sm:$0xff] %v5253_v7   ;;  %5568 = vst [vmem:[#allocation2 + $0xe0] sm:$0xff] %v5333_v8   ;;  %v6193_v62 = vld [vmem:[#allocation2 + $0xd8] sm:$0xff]   ;;  %v6199_v5 = vld [vmem:[#allocation2 + $0x90] sm:$0xff]  }
 0x321   :  { %v1800_v11 = vpop.f32.mrf.mxu0  ;;  %v1913_v12 = vpop.f32.mrf.mxu1  ;;  %v6201_v7 = vld [vmem:[#allocation2 + $0xc8] sm:$0xff]  }
 0x322   :  { %v6202_v8 = vld [vmem:[#allocation2 + $0x8] sm:$0xff]  }
 0x323   :  { %v1802_v13 = vpop.f32.mrf.mxu0  ;;  %v1915_v46 = vpop.f32.mrf.mxu1 }
 0x324   :  { %v5218_v14 = vpack.c.bf16 %v1802_v13, %v1798_v9  ;;  %v5298_v15 = vpack.c.bf16 %v1915_v46, %v1911_v10  ;;  %v6203_v9 = vld [vmem:[#allocation2 + $0x88] sm:$0xff]   ;;  %v6204_v10 = vld [vmem:[#allocation2 + $0x40] sm:$0xff]  }
 0x325   :  { %v1804_v16 = vpop.f32.mrf.mxu0  ;;  %v1917_v17 = vpop.f32.mrf.mxu1  ;;  %v6190_v59 = vld [vmem:[#allocation2 + $0x20] sm:$0xff]   ;;  %v6261_v46 = vld [vmem:[#allocation5 + $0x2ec] ss:$16 sps:$4 sm:$0xff]  }
 0x326   :  { %5545 = vst [vmem:[#allocation2 + $0x28] sm:$0xff] %v5218_v14   ;;  %5561 = vst [vmem:[#allocation2 + $0xa8] sm:$0xff] %v5298_v15   ;;  %v5258_v18 = vpack.c.bf16 %v1804_v16, %v1800_v11  ;;  %v5338_v19 = vpack.c.bf16 %v1917_v17, %v1913_v12  ;;  %v6191_v60 = vld [vmem:[#allocation2 + $0xa0] sm:$0xff]   ;;  %v6211_v16 = vld [vmem:[#allocation3 + $0x8] ss:$16 sps:$4 sm:$0xff]  }
 0x327   :  { %v1808_v20 = vpop.f32.mrf.mxu0  ;;  %v1921_v21 = vpop.f32.mrf.mxu1  ;;  %v6188_v57 = vld [vmem:[#allocation2 + $0x60] sm:$0xff]  }
 0x328   :  { %5553 = vst [vmem:[#allocation2 + $0x68] sm:$0xff] %v5258_v18   ;;  %5569 = vst [vmem:[#allocation2 + $0xe8] sm:$0xff] %v5338_v19   ;;  %v6189_v58 = vld [vmem:[#allocation2 + $0xe0] sm:$0xff]   ;;  %v6216_v18 = vld [vmem:[#allocation3 + $0x2c] ss:$16 sps:$4 sm:$0xff]  }
 0x329   :  { %v1810_v22 = vpop.f32.mrf.mxu0  ;;  %v1923_v23 = vpop.f32.mrf.mxu1  ;;  %v6205_v11 = vld [vmem:[#allocation2 + $0xc0] sm:$0xff]  }
 0x32a   :  { %v6258_v12 = vld [vmem:[#allocation5 + $0x2e4] ss:$16 sps:$4 sm:$0xff]   ;;  %v6208_v15 = vld [vmem:[#allocation3] ss:$16 sps:$4 sm:$0xff]  }
 0x32b   :  { %v1812_v24 = vpop.f32.mrf.mxu0  ;;  %v1925_v25 = vpop.f32.mrf.mxu1  ;;  %v6206_v13 = vld [vmem:[#allocation2] sm:$0xff]  }
 0x32c   :  { %v5223_v26 = vpack.c.bf16 %v1812_v24, %v1808_v20  ;;  %v5303_v27 = vpack.c.bf16 %v1925_v25, %v1921_v21  ;;  %v6207_v14 = vld [vmem:[#allocation2 + $0x80] sm:$0xff]   ;;  %v6259_v20 = vld [vmem:[#allocation5 + $0x2e8] ss:$16 sps:$4 sm:$0xff]  }
 0x32d   :  { %v1814_v28 = vpop.f32.mrf.mxu0  ;;  %v1927_v29 = vpop.f32.mrf.mxu1  ;;  %v6186_v55 = vld [vmem:[#allocation2 + $0x28] sm:$0xff]   ;;  %v6214_v17 = vld [vmem:[#allocation3 + $0x24] ss:$16 sps:$4 sm:$0xff]   ;;  %v6256_v19 = vld [vmem:[#allocation5 + $0x2e0] ss:$16 sps:$4 sm:$0xff]  }
 0x32e   :  { %5546 = vst [vmem:[#allocation2 + $0x30] sm:$0xff] %v5223_v26   ;;  %5562 = vst [vmem:[#allocation2 + $0xb0] sm:$0xff] %v5303_v27   ;;  %v5263_v30 = vpack.c.bf16 %v1814_v28, %v1810_v22  ;;  %v5343_v31 = vpack.c.bf16 %v1927_v29, %v1923_v23  ;;  %v6187_v56 = vld [vmem:[#allocation2 + $0xa8] sm:$0xff]   ;;  %v6264_v21 = vld [vmem:[#allocation5 + $0x2c4] ss:$16 sps:$4 sm:$0xff]  }
 0x32f   :  { %v1818_v32 = vpop.f32.mrf.mxu0  ;;  %v1931_v33 = vpop.f32.mrf.mxu1  ;;  %v6184_v53 = vld [vmem:[#allocation2 + $0x68] sm:$0xff]   ;;  %v6262_v23 = vld [vmem:[#allocation5 + $0x2c0] ss:$16 sps:$4 sm:$0xff]   ;;  %v6270_v25 = vld [vmem:[#allocation5 + $0x2a4] ss:$16 sps:$4 sm:$0xff]  }
 0x330   :  { %5554 = vst [vmem:[#allocation2 + $0x70] sm:$0xff] %v5263_v30   ;;  %5570 = vst [vmem:[#allocation2 + $0xf0] sm:$0xff] %v5343_v31   ;;  %v6185_v54 = vld [vmem:[#allocation2 + $0xe8] sm:$0xff]   ;;  %v6218_v26 = vld [vmem:[#allocation3 + $0x20] ss:$16 sps:$4 sm:$0xff]  }
 0x331   :  { %v1820_v34 = vpop.f32.mrf.mxu0  ;;  %v1933_v35 = vpop.f32.mrf.mxu1  ;;  %v6267_v22 = vld [vmem:[#allocation5 + $0x2cc] ss:$16 sps:$4 sm:$0xff]   ;;  %v6265_v24 = vld [vmem:[#allocation5 + $0x2c8] ss:$16 sps:$4 sm:$0xff]   ;;  %v6220_v29 = vld [vmem:[#allocation3 + $0x44] ss:$16 sps:$4 sm:$0xff]  }
 0x332   :  { %v6273_v27 = vld [vmem:[#allocation5 + $0x2ac] ss:$16 sps:$4 sm:$0xff]   ;;  %v6219_v28 = vld [vmem:[#allocation3 + $0x28] ss:$16 sps:$4 sm:$0xff]   ;;  %v6268_v31 = vld [vmem:[#allocation5 + $0x2a0] ss:$16 sps:$4 sm:$0xff]  }
 0x333   :  { %v1822_v36 = vpop.f32.mrf.mxu0  ;;  %v1935_v37 = vpop.f32.mrf.mxu1  ;;  %v6222_v30 = vld [vmem:[#allocation3 + $0x4c] ss:$16 sps:$4 sm:$0xff]  }
 0x334   :  { %v5228_v38 = vpack.c.bf16 %v1822_v36, %v1818_v32  ;;  %v5308_v39 = vpack.c.bf16 %v1935_v37, %v1931_v33  ;;  %v6271_v32 = vld [vmem:[#allocation5 + $0x2a8] ss:$16 sps:$4 sm:$0xff]   ;;  %v6276_v33 = vld [vmem:[#allocation5 + $0x284] ss:$16 sps:$4 sm:$0xff]   ;;  %v6224_v37 = vld [vmem:[#allocation3 + $0x40] ss:$16 sps:$4 sm:$0xff]  }
 0x335   :  { %v1824_v40 = vpop.f32.mrf.mxu0  ;;  %v1937_v41 = vpop.f32.mrf.mxu1  ;;  %v6182_v51 = vld [vmem:[#allocation2 + $0x30] sm:$0xff]   ;;  %v6277_v36 = vld [vmem:[#allocation5 + $0x288] ss:$16 sps:$4 sm:$0xff]  }
 0x336   :  { %5547 = vst [vmem:[#allocation2 + $0x38] sm:$0xff] %v5228_v38   ;;  %5563 = vst [vmem:[#allocation2 + $0xb8] sm:$0xff] %v5308_v39   ;;  %v5268_v42 = vpack.c.bf16 %v1824_v40, %v1820_v34  ;;  %v5348_v43 = vpack.c.bf16 %v1937_v41, %v1933_v35  ;;  %v6183_v52 = vld [vmem:[#allocation2 + $0xb0] sm:$0xff]   ;;  %v6279_v34 = vld [vmem:[#allocation5 + $0x28c] ss:$16 sps:$4 sm:$0xff]  }
 0x337   :  { %v6180_v49 = vld [vmem:[#allocation2 + $0x70] sm:$0xff]   ;;  %v6225_v38 = vld [vmem:[#allocation3 + $0x48] ss:$16 sps:$4 sm:$0xff]   ;;  %v6228_v40 = vld [vmem:[#allocation3 + $0x6c] ss:$16 sps:$4 sm:$0xff]  }
 0x338   :  { %5555 = vst [vmem:[#allocation2 + $0x78] sm:$0xff] %v5268_v42   ;;  %5571 = vst [vmem:[#allocation2 + $0xf8] sm:$0xff] %v5348_v43   ;;  %v6181_v50 = vld [vmem:[#allocation2 + $0xf0] sm:$0xff]   ;;  %v6231_v42 = vld [vmem:[#allocation3 + $0x68] ss:$16 sps:$4 sm:$0xff]  }
 0x339   :  { %v6274_v35 = vld [vmem:[#allocation5 + $0x280] ss:$16 sps:$4 sm:$0xff]   ;;  %v6226_v39 = vld [vmem:[#allocation3 + $0x64] ss:$16 sps:$4 sm:$0xff]  }
 0x33a   :  { %v6230_v41 = vld [vmem:[#allocation3 + $0x60] ss:$16 sps:$4 sm:$0xff]   ;;  %v6234_v43 = vld [vmem:[#allocation3 + $0x84] ss:$16 sps:$4 sm:$0xff]  }
 0x33d   :  { %v6178_v44 = vld [vmem:[#allocation2 + $0x38] sm:$0xff]  }
 0x33e   :  { %v6179_v48 = vld [vmem:[#allocation2 + $0xb8] sm:$0xff]  }
 0x33f   :  { %v6176_v45 = vld [vmem:[#allocation2 + $0x78] sm:$0xff]  }
 0x340   :  { %v6177_v47 = vld [vmem:[#allocation2 + $0xf8] sm:$0xff]   ;;  %5731 = vmatprep.subr.bf16.mxu0 %v6176_v45  ;;  %v6232_v45 = vld [vmem:[#allocation3 + $0x80] ss:$16 sps:$4 sm:$0xff]  }
 0x341   :  { %5795 = vmatprep.subr.bf16.mxu1 %v6177_v47  ;;  %5732 = vmatpush3.bf16.msra.mxu0 %v6178_v44  ;;  %v6237_v44 = vld [vmem:[#allocation3 + $0x8c] ss:$16 sps:$4 sm:$0xff]   ;;  %v6235_v47 = vld [vmem:[#allocation3 + $0x88] ss:$16 sps:$4 sm:$0xff]  }
 0x342   :  { %5796 = vmatpush3.bf16.msra.mxu1 %v6179_v48  ;;  %5733 = vmatprep.subr.bf16.mxu0 %v6180_v49  ;;  %v6240_v48 = vld [vmem:[#allocation3 + $0xa4] ss:$16 sps:$4 sm:$0xff]   ;;  %v6243_v49 = vld [vmem:[#allocation3 + $0xac] ss:$16 sps:$4 sm:$0xff]  }
 0x343   :  { %5797 = vmatprep.subr.bf16.mxu1 %v6181_v50  ;;  %v6238_v50 = vld [vmem:[#allocation3 + $0xa0] ss:$16 sps:$4 sm:$0xff]  }
 0x345   :  { %5734 = vmatpush3.bf16.msra.mxu0 %v6182_v51  ;;  %v6241_v51 = vld [vmem:[#allocation3 + $0xa8] ss:$16 sps:$4 sm:$0xff]  }
 0x346   :  { %5798 = vmatpush3.bf16.msra.mxu1 %v6183_v52  ;;  %5735 = vmatprep.subr.bf16.mxu0 %v6184_v53  ;;  %v6246_v52 = vld [vmem:[#allocation3 + $0xc4] ss:$16 sps:$4 sm:$0xff]   ;;  %v6249_v53 = vld [vmem:[#allocation3 + $0xcc] ss:$16 sps:$4 sm:$0xff]  }
 0x347   :  { %5799 = vmatprep.subr.bf16.mxu1 %v6185_v54  ;;  %v6244_v54 = vld [vmem:[#allocation3 + $0xc0] ss:$16 sps:$4 sm:$0xff]  }
 0x349   :  { %5736 = vmatpush3.bf16.msra.mxu0 %v6186_v55  ;;  %v6247_v55 = vld [vmem:[#allocation3 + $0xc8] ss:$16 sps:$4 sm:$0xff]  }
 0x34a   :  { %5800 = vmatpush3.bf16.msra.mxu1 %v6187_v56  ;;  %5737 = vmatprep.subr.bf16.mxu0 %v6188_v57  ;;  %v6252_v56 = vld [vmem:[#allocation3 + $0xe4] ss:$16 sps:$4 sm:$0xff]   ;;  %v6255_v57 = vld [vmem:[#allocation3 + $0xec] ss:$16 sps:$4 sm:$0xff]  }
 0x34b   :  { %5801 = vmatprep.subr.bf16.mxu1 %v6189_v58  ;;  %v6250_v58 = vld [vmem:[#allocation3 + $0xe0] ss:$16 sps:$4 sm:$0xff]  }
 0x34d   :  { %5738 = vmatpush3.bf16.msra.mxu0 %v6190_v59  ;;  %v6253_v59 = vld [vmem:[#allocation3 + $0xe8] ss:$16 sps:$4 sm:$0xff]  }
 0x34e   :  { %5802 = vmatpush3.bf16.msra.mxu1 %v6191_v60  ;;  %5739 = vmatprep.subr.bf16.mxu0 %v6192_v61  ;;  %v6282_v60 = vld [vmem:[#allocation5 + $0x264] ss:$16 sps:$4 sm:$0xff]   ;;  %v6285_v61 = vld [vmem:[#allocation5 + $0x26c] ss:$16 sps:$4 sm:$0xff]  }
 0x34f   :  { %5803 = vmatprep.subr.bf16.mxu1 %v6193_v62  ;;  %v6280_v62 = vld [vmem:[#allocation5 + $0x260] ss:$16 sps:$4 sm:$0xff]  }
 0x351   :  { %5740 = vmatpush3.bf16.msra.mxu0 %v6194_v63  ;;  %v6283_v63 = vld [vmem:[#allocation5 + $0x268] ss:$16 sps:$4 sm:$0xff]  }
 0x352   :  { %5804 = vmatpush3.bf16.msra.mxu1 %v6195_v1  ;;  %5741 = vmatprep.subr.bf16.mxu0 %v6196_v2  ;;  %v6288_v1 = vld [vmem:[#allocation5 + $0x244] ss:$16 sps:$4 sm:$0xff]   ;;  %v6291_v2 = vld [vmem:[#allocation5 + $0x24c] ss:$16 sps:$4 sm:$0xff]  }
 0x353   :  { %5805 = vmatprep.subr.bf16.mxu1 %v6197_v3  ;;  %v6286_v3 = vld [vmem:[#allocation5 + $0x240] ss:$16 sps:$4 sm:$0xff]  }
 0x355   :  { %5742 = vmatpush3.bf16.msra.mxu0 %v6198_v4  ;;  %v6289_v4 = vld [vmem:[#allocation5 + $0x248] ss:$16 sps:$4 sm:$0xff]  }
 0x356   :  { %5806 = vmatpush3.bf16.msra.mxu1 %v6199_v5  ;;  %5743 = vmatprep.subr.bf16.mxu0 %v6200_v6  ;;  %v6294_v5 = vld [vmem:[#allocation5 + $0x224] ss:$16 sps:$4 sm:$0xff]   ;;  %v6297_v6 = vld [vmem:[#allocation5 + $0x22c] ss:$16 sps:$4 sm:$0xff]  }
 0x357   :  { %5807 = vmatprep.subr.bf16.mxu1 %v6201_v7  ;;  %v6292_v7 = vld [vmem:[#allocation5 + $0x220] ss:$16 sps:$4 sm:$0xff]  }
 0x359   :  { %5744 = vmatpush3.bf16.msra.mxu0 %v6202_v8  ;;  %v6295_v8 = vld [vmem:[#allocation5 + $0x228] ss:$16 sps:$4 sm:$0xff]  }
 0x35a   :  { %5808 = vmatpush3.bf16.msra.mxu1 %v6203_v9  ;;  %5745 = vmatprep.subr.bf16.mxu0 %v6204_v10  ;;  %v6300_v9 = vld [vmem:[#allocation5 + $0x204] ss:$16 sps:$4 sm:$0xff]   ;;  %v6303_v10 = vld [vmem:[#allocation5 + $0x20c] ss:$16 sps:$4 sm:$0xff]  }
 0x35b   :  { %5809 = vmatprep.subr.bf16.mxu1 %v6205_v11  ;;  %v6298_v11 = vld [vmem:[#allocation5 + $0x200] ss:$16 sps:$4 sm:$0xff]  }
 0x35d   :  { %5746 = vmatpush3.bf16.msra.mxu0 %v6206_v13 }
 0x35e   :  { %5810 = vmatpush3.bf16.msra.mxu1 %v6207_v14  ;;  %3127 = vmatprep.subr.bf16.mxu0 %v6258_v12  ;;  %v6301_v12 = vld [vmem:[#allocation5 + $0x208] ss:$16 sps:$4 sm:$0xff]   ;;  %v6546_v14 = vld [vmem:[%s6650_s3 + $0x1] ss:$0 sm:$0xff] }
 0x35f   :  { %3240 = vmatprep.subr.bf16.mxu1 %v6261_v46 }
 0x360   :  { %2749 = vmatmul.mubr.bf16.vlgmr.msra.gmra.mxu0 %v6208_v15 }
 0x361   :  { %2846 = vmatmul.mubr.bf16.vlgmr.msra.gmra.mxu1 %v6211_v16  ;;  %2756 = vmatprep.mubr.bf16.mxu0 %v6214_v17 }
 0x362   :  { %2853 = vmatprep.mubr.bf16.mxu1 %v6216_v18  ;;  %3128 = vmatpush1.bf16.msra.mxu0 %v6256_v19 }
 0x363   :  { %3241 = vmatpush1.bf16.msra.mxu1 %v6259_v20  ;;  %3129 = vmatprep.subr.bf16.mxu0 %v6264_v21 }
 0x364   :  { %3242 = vmatprep.subr.bf16.mxu1 %v6267_v22 }
 0x366   :  { %3130 = vmatpush1.bf16.msra.mxu0 %v6262_v23 }
 0x367   :  { %3243 = vmatpush1.bf16.msra.mxu1 %v6265_v24  ;;  %3131 = vmatprep.subr.bf16.mxu0 %v6270_v25 }
 0x368   :  { %2757 = vmatmul.mubr.bf16.gmra.mxu0 %v6218_v26  ;;  %3244 = vmatprep.subr.bf16.mxu1 %v6273_v27 }
 0x369   :  { %2854 = vmatmul.mubr.bf16.gmra.mxu1 %v6219_v28  ;;  %2764 = vmatprep.mubr.bf16.mxu0 %v6220_v29 }
 0x36a   :  { %2861 = vmatprep.mubr.bf16.mxu1 %v6222_v30  ;;  %3132 = vmatpush1.bf16.msra.mxu0 %v6268_v31 }
 0x36b   :  { %3245 = vmatpush1.bf16.msra.mxu1 %v6271_v32  ;;  %3133 = vmatprep.subr.bf16.mxu0 %v6276_v33 }
 0x36c   :  { %3246 = vmatprep.subr.bf16.mxu1 %v6279_v34 }
 0x36e   :  { %3134 = vmatpush1.bf16.msra.mxu0 %v6274_v35 }
 0x36f   :  { %3247 = vmatpush1.bf16.msra.mxu1 %v6277_v36  ;;  %3135 = vmatprep.subr.bf16.mxu0 %v6282_v60 }
 0x370   :  { %2765 = vmatmul.mubr.bf16.gmra.mxu0 %v6224_v37  ;;  %3248 = vmatprep.subr.bf16.mxu1 %v6285_v61 }
 0x371   :  { %2862 = vmatmul.mubr.bf16.gmra.mxu1 %v6225_v38  ;;  %2772 = vmatprep.mubr.bf16.mxu0 %v6226_v39 }
 0x372   :  { %2869 = vmatprep.mubr.bf16.mxu1 %v6228_v40  ;;  %3136 = vmatpush1.bf16.msra.mxu0 %v6280_v62 }
 0x373   :  { %3249 = vmatpush1.bf16.msra.mxu1 %v6283_v63  ;;  %3137 = vmatprep.subr.bf16.mxu0 %v6288_v1 }
 0x374   :  { %3250 = vmatprep.subr.bf16.mxu1 %v6291_v2 }
 0x376   :  { %3138 = vmatpush1.bf16.msra.mxu0 %v6286_v3 }
 0x377   :  { %3251 = vmatpush1.bf16.msra.mxu1 %v6289_v4  ;;  %3139 = vmatprep.subr.bf16.mxu0 %v6294_v5 }
 0x378   :  { %2773 = vmatmul.mubr.bf16.gmra.mxu0 %v6230_v41  ;;  %3252 = vmatprep.subr.bf16.mxu1 %v6297_v6 }
 0x379   :  { %2870 = vmatmul.mubr.bf16.gmra.mxu1 %v6231_v42  ;;  %2780 = vmatprep.mubr.bf16.mxu0 %v6234_v43 }
 0x37a   :  { %2877 = vmatprep.mubr.bf16.mxu1 %v6237_v44  ;;  %3140 = vmatpush1.bf16.msra.mxu0 %v6292_v7 }
 0x37b   :  { %3253 = vmatpush1.bf16.msra.mxu1 %v6295_v8  ;;  %3141 = vmatprep.subr.bf16.mxu0 %v6300_v9 }
 0x37c   :  { %3254 = vmatprep.subr.bf16.mxu1 %v6303_v10 }
 0x37e   :  { %3142 = vmatpush1.bf16.msra.mxu0 %v6298_v11 }
 0x37f   :  { %3255 = vmatpush1.bf16.msra.mxu1 %v6301_v12 }
 0x380   :  { %2781 = vmatmul.mubr.bf16.gmra.mxu0 %v6232_v45 }
 0x381   :  { %2878 = vmatmul.mubr.bf16.gmra.mxu1 %v6235_v47  ;;  %2788 = vmatprep.mubr.bf16.mxu0 %v6240_v48 }
 0x382   :  { %2885 = vmatprep.mubr.bf16.mxu1 %v6243_v49 }
 0x388   :  { %2789 = vmatmul.mubr.bf16.gmra.mxu0 %v6238_v50 }
 0x389   :  { %2886 = vmatmul.mubr.bf16.gmra.mxu1 %v6241_v51  ;;  %2796 = vmatprep.mubr.bf16.mxu0 %v6246_v52 }
 0x38a   :  { %2893 = vmatprep.mubr.bf16.mxu1 %v6249_v53 }
 0x390   :  { %2797 = vmatmul.mubr.bf16.gmra.mxu0 %v6244_v54 }
 0x391   :  { %2894 = vmatmul.mubr.bf16.gmra.mxu1 %v6247_v55  ;;  %2804 = vmatprep.mubr.bf16.mxu0 %v6252_v56 }
 0x392   :  { %2901 = vmatprep.mubr.bf16.mxu1 %v6255_v57 }
 0x398   :  { %2805 = vmatmul.mubr.bf16.gmra.mxu0 %v6250_v58 }
 0x399   :  { %2902 = vmatmul.mubr.bf16.gmra.mxu1 %v6253_v59  ;;  %3159 = vmatprep.mubr.bf16.mxu0 %v6432_v0 }
 0x39a   :  { %3272 = vmatprep.mubr.bf16.mxu1 %v6432_v0 }
 0x420   :  { %v5747_v13 = vpop.f32.mrf.mxu0 }
 0x421   :  { %v5811_v46 = vpop.f32.mrf.mxu1 }
 0x422   :  { %v5748_v15 = vpop.f32.mrf.mxu0 }
 0x423   :  { %v5749_v16 = vadd.f32 %v5748_v15, %v5747_v13  ;;  %v5812_v17 = vpop.f32.mrf.mxu1 }
 0x424   :  { %v5750_v18 = vpop.f32.mrf.mxu0  ;;  %v5813_v22 = vadd.f32 %v5812_v17, %v5811_v46 }
 0x425   :  { %v2751_v19 = vadd.f32 %v5749_v16, %v6546_v14  ;;  %v5814_v20 = vpop.f32.mrf.mxu1 }
 0x426   :  { %v5751_v21 = vpop.f32.mrf.mxu0 }
 0x427   :  { %v5752_v23 = vadd.f32 %v5751_v21, %v5750_v18  ;;  %v5815_v24 = vpop.f32.mrf.mxu1  ;;  %v2848_v26 = vadd.f32 %v5813_v22, %v2751_v19 }
 0x428   :  { %v5753_v25 = vpop.f32.mrf.mxu0  ;;  %v5816_v28 = vadd.f32 %v5815_v24, %v5814_v20 }
 0x429   :  { %v2754_v27 = vadd.f32 %v5752_v23, %v6546_v14  ;;  %v5817_v29 = vpop.f32.mrf.mxu1  ;;  %v2910_v35 = vmax.f32 %v2848_v26, 0.0 }
 0x42a   :  { %v5754_v30 = vpop.f32.mrf.mxu0 }
 0x42b   :  { %v2851_v31 = vadd.f32 %v5816_v28, %v2754_v27  ;;  %v5755_v32 = vadd.f32 %v5754_v30, %v5753_v25  ;;  %v5818_v33 = vpop.f32.mrf.mxu1 }
 0x42c   :  { %v5756_v34 = vpop.f32.mrf.mxu0  ;;  %v5819_v41 = vadd.f32 %v5818_v33, %v5817_v29 }
 0x42d   :  { %v2911_v36 = vmax.f32 %v2851_v31, 0.0  ;;  %v2759_v37 = vadd.f32 %v5755_v32, %v6546_v14  ;;  %v5820_v38 = vpop.f32.mrf.mxu1 }
 0x42e   :  { %v5757_v39 = vpop.f32.mrf.mxu0 }
 0x42f   :  { %v2926_v40 = vpack.c.bf16 %v2911_v36, %v2910_v35  ;;  %v5758_v42 = vadd.f32 %v5757_v39, %v5756_v34  ;;  %v5821_v43 = vpop.f32.mrf.mxu1  ;;  %v2856_v45 = vadd.f32 %v5819_v41, %v2759_v37 }
 0x430   :  { %v5759_v44 = vpop.f32.mrf.mxu0  ;;  %v5822_v48 = vadd.f32 %v5821_v43, %v5820_v38 }
 0x431   :  { %v2762_v47 = vadd.f32 %v5758_v42, %v6546_v14  ;;  %v5823_v49 = vpop.f32.mrf.mxu1  ;;  %3160 = vmatmul.mubr.bf16.vlgmr.msra.gmra.mxu0 %v2926_v40  ;;  %3273 = vmatmul.mubr.bf16.vlgmr.msra.gmra.mxu1 %v2926_v40  ;;  %v2912_v55 = vmax.f32 %v2856_v45, 0.0 }
 0x432   :  { %v5760_v50 = vpop.f32.mrf.mxu0  ;;  %3169 = vmatprep.mubr.bf16.mxu0 %v6432_v0  ;;  %3282 = vmatprep.mubr.bf16.mxu1 %v6432_v0 }
 0x433   :  { %v2859_v51 = vadd.f32 %v5822_v48, %v2762_v47  ;;  %v5761_v52 = vadd.f32 %v5760_v50, %v5759_v44  ;;  %v5824_v53 = vpop.f32.mrf.mxu1 }
 0x434   :  { %v5762_v54 = vpop.f32.mrf.mxu0  ;;  %v5825_v61 = vadd.f32 %v5824_v53, %v5823_v49 }
 0x435   :  { %v2913_v56 = vmax.f32 %v2859_v51, 0.0  ;;  %v2767_v57 = vadd.f32 %v5761_v52, %v6546_v14  ;;  %v5826_v58 = vpop.f32.mrf.mxu1 }
 0x436   :  { %v5763_v59 = vpop.f32.mrf.mxu0 }
 0x437   :  { %v2927_v60 = vpack.c.bf16 %v2913_v56, %v2912_v55  ;;  %v5764_v62 = vadd.f32 %v5763_v59, %v5762_v54  ;;  %v5827_v63 = vpop.f32.mrf.mxu1  ;;  %v2864_v2 = vadd.f32 %v5825_v61, %v2767_v57 }
 0x438   :  { %v5765_v1 = vpop.f32.mrf.mxu0  ;;  %v5828_v4 = vadd.f32 %v5827_v63, %v5826_v58 }
 0x439   :  { %v2770_v3 = vadd.f32 %v5764_v62, %v6546_v14  ;;  %v5829_v5 = vpop.f32.mrf.mxu1  ;;  %3170 = vmatmul.mubr.bf16.gmra.mxu0 %v2927_v60  ;;  %3283 = vmatmul.mubr.bf16.gmra.mxu1 %v2927_v60  ;;  %v2914_v11 = vmax.f32 %v2864_v2, 0.0 }
 0x43a   :  { %v5766_v6 = vpop.f32.mrf.mxu0  ;;  %3179 = vmatprep.mubr.bf16.mxu0 %v6432_v0  ;;  %3292 = vmatprep.mubr.bf16.mxu1 %v6432_v0 }
 0x43b   :  { %v2867_v7 = vadd.f32 %v5828_v4, %v2770_v3  ;;  %v5767_v8 = vadd.f32 %v5766_v6, %v5765_v1  ;;  %v5830_v9 = vpop.f32.mrf.mxu1 }
 0x43c   :  { %v5768_v10 = vpop.f32.mrf.mxu0  ;;  %v5831_v17 = vadd.f32 %v5830_v9, %v5829_v5 }
 0x43d   :  { %v2915_v12 = vmax.f32 %v2867_v7, 0.0  ;;  %v2775_v13 = vadd.f32 %v5767_v8, %v6546_v14  ;;  %v5832_v46 = vpop.f32.mrf.mxu1 }
 0x43e   :  { %v5769_v15 = vpop.f32.mrf.mxu0 }
 0x43f   :  { %v2928_v16 = vpack.c.bf16 %v2915_v12, %v2914_v11  ;;  %v5770_v18 = vadd.f32 %v5769_v15, %v5768_v10  ;;  %v5833_v19 = vpop.f32.mrf.mxu1  ;;  %v2872_v21 = vadd.f32 %v5831_v17, %v2775_v13 }
 0x440   :  { %v5771_v20 = vpop.f32.mrf.mxu0  ;;  %v5834_v23 = vadd.f32 %v5833_v19, %v5832_v46 }
 0x441   :  { %v2778_v22 = vadd.f32 %v5770_v18, %v6546_v14  ;;  %v5835_v24 = vpop.f32.mrf.mxu1  ;;  %3180 = vmatmul.mubr.bf16.gmra.mxu0 %v2928_v16  ;;  %3293 = vmatmul.mubr.bf16.gmra.mxu1 %v2928_v16  ;;  %v2916_v30 = vmax.f32 %v2872_v21, 0.0 }
 0x442   :  { %v5772_v25 = vpop.f32.mrf.mxu0  ;;  %3189 = vmatprep.mubr.bf16.mxu0 %v6432_v0  ;;  %3302 = vmatprep.mubr.bf16.mxu1 %v6432_v0 }
 0x443   :  { %v2875_v26 = vadd.f32 %v5834_v23, %v2778_v22  ;;  %v5773_v27 = vadd.f32 %v5772_v25, %v5771_v20  ;;  %v5836_v28 = vpop.f32.mrf.mxu1 }
 0x444   :  { %v5774_v29 = vpop.f32.mrf.mxu0  ;;  %v5837_v36 = vadd.f32 %v5836_v28, %v5835_v24 }
 0x445   :  { %v2917_v31 = vmax.f32 %v2875_v26, 0.0  ;;  %v2783_v32 = vadd.f32 %v5773_v27, %v6546_v14  ;;  %v5838_v33 = vpop.f32.mrf.mxu1 }
 0x446   :  { %v5775_v34 = vpop.f32.mrf.mxu0 }
 0x447   :  { %v2929_v35 = vpack.c.bf16 %v2917_v31, %v2916_v30  ;;  %v5776_v37 = vadd.f32 %v5775_v34, %v5774_v29  ;;  %v5839_v38 = vpop.f32.mrf.mxu1  ;;  %v2880_v40 = vadd.f32 %v5837_v36, %v2783_v32 }
 0x448   :  { %v5777_v39 = vpop.f32.mrf.mxu0  ;;  %v5840_v42 = vadd.f32 %v5839_v38, %v5838_v33 }
 0x449   :  { %v2786_v41 = vadd.f32 %v5776_v37, %v6546_v14  ;;  %v5841_v43 = vpop.f32.mrf.mxu1  ;;  %3190 = vmatmul.mubr.bf16.gmra.mxu0 %v2929_v35  ;;  %3303 = vmatmul.mubr.bf16.gmra.mxu1 %v2929_v35  ;;  %v2918_v50 = vmax.f32 %v2880_v40, 0.0 }
 0x44a   :  { %v5778_v44 = vpop.f32.mrf.mxu0  ;;  %3199 = vmatprep.mubr.bf16.mxu0 %v6432_v0  ;;  %3312 = vmatprep.mubr.bf16.mxu1 %v6432_v0 }
 0x44b   :  { %v2883_v45 = vadd.f32 %v5840_v42, %v2786_v41  ;;  %v5779_v47 = vadd.f32 %v5778_v44, %v5777_v39  ;;  %v5842_v48 = vpop.f32.mrf.mxu1  ;;  %v6338_v41 = vld [vmem:[#allocation3 + $0x4] ss:$16 sps:$4 sm:$0xff]   ;;  %v6341_v42 = vld [vmem:[#allocation3 + $0xc] ss:$16 sps:$4 sm:$0xff]  }
 0x44c   :  { %v5780_v49 = vpop.f32.mrf.mxu0  ;;  %v5843_v56 = vadd.f32 %v5842_v48, %v5841_v43 }
 0x44d   :  { %v2919_v51 = vmax.f32 %v2883_v45, 0.0  ;;  %v2791_v52 = vadd.f32 %v5779_v47, %v6546_v14  ;;  %v5844_v53 = vpop.f32.mrf.mxu1 }
 0x44e   :  { %v5781_v54 = vpop.f32.mrf.mxu0 }
 0x44f   :  { %v2930_v55 = vpack.c.bf16 %v2919_v51, %v2918_v50  ;;  %v5782_v57 = vadd.f32 %v5781_v54, %v5780_v49  ;;  %v5845_v58 = vpop.f32.mrf.mxu1  ;;  %v2888_v60 = vadd.f32 %v5843_v56, %v2791_v52 }
 0x450   :  { %v5783_v59 = vpop.f32.mrf.mxu0  ;;  %v5846_v62 = vadd.f32 %v5845_v58, %v5844_v53 }
 0x451   :  { %v2794_v61 = vadd.f32 %v5782_v57, %v6546_v14  ;;  %v5847_v63 = vpop.f32.mrf.mxu1  ;;  %3200 = vmatmul.mubr.bf16.gmra.mxu0 %v2930_v55  ;;  %3313 = vmatmul.mubr.bf16.gmra.mxu1 %v2930_v55  ;;  %v2920_v6 = vmax.f32 %v2888_v60, 0.0 }
 0x452   :  { %v5784_v1 = vpop.f32.mrf.mxu0  ;;  %3209 = vmatprep.mubr.bf16.mxu0 %v6432_v0  ;;  %3322 = vmatprep.mubr.bf16.mxu1 %v6432_v0 }
 0x453   :  { %v2891_v2 = vadd.f32 %v5846_v62, %v2794_v61  ;;  %v5785_v3 = vadd.f32 %v5784_v1, %v5783_v59  ;;  %v5848_v4 = vpop.f32.mrf.mxu1 }
 0x454   :  { %v5786_v5 = vpop.f32.mrf.mxu0  ;;  %v5849_v12 = vadd.f32 %v5848_v4, %v5847_v63 }
 0x455   :  { %v2921_v7 = vmax.f32 %v2891_v2, 0.0  ;;  %v2799_v8 = vadd.f32 %v5785_v3, %v6546_v14  ;;  %v5850_v9 = vpop.f32.mrf.mxu1 }
 0x456   :  { %v5787_v10 = vpop.f32.mrf.mxu0 }
 0x457   :  { %v2931_v11 = vpack.c.bf16 %v2921_v7, %v2920_v6  ;;  %v5788_v13 = vadd.f32 %v5787_v10, %v5786_v5  ;;  %v5851_v46 = vpop.f32.mrf.mxu1  ;;  %v2896_v16 = vadd.f32 %v5849_v12, %v2799_v8 }
 0x458   :  { %v5789_v15 = vpop.f32.mrf.mxu0  ;;  %v5852_v18 = vadd.f32 %v5851_v46, %v5850_v9 }
 0x459   :  { %v2802_v17 = vadd.f32 %v5788_v13, %v6546_v14  ;;  %v5853_v19 = vpop.f32.mrf.mxu1  ;;  %3210 = vmatmul.mubr.bf16.gmra.mxu0 %v2931_v11  ;;  %3323 = vmatmul.mubr.bf16.gmra.mxu1 %v2931_v11  ;;  %v2922_v25 = vmax.f32 %v2896_v16, 0.0 }
 0x45a   :  { %v5790_v20 = vpop.f32.mrf.mxu0  ;;  %3219 = vmatprep.mubr.bf16.mxu0 %v6432_v0  ;;  %3332 = vmatprep.mubr.bf16.mxu1 %v6432_v0 }
 0x45b   :  { %v2899_v21 = vadd.f32 %v5852_v18, %v2802_v17  ;;  %v5791_v22 = vadd.f32 %v5790_v20, %v5789_v15  ;;  %v5854_v23 = vpop.f32.mrf.mxu1 }
 0x45c   :  { %v5792_v24 = vpop.f32.mrf.mxu0  ;;  %v5855_v31 = vadd.f32 %v5854_v23, %v5853_v19 }
 0x45d   :  { %v2923_v26 = vmax.f32 %v2899_v21, 0.0  ;;  %v2807_v27 = vadd.f32 %v5791_v22, %v6546_v14  ;;  %v5856_v28 = vpop.f32.mrf.mxu1 }
 0x45e   :  { %v5793_v29 = vpop.f32.mrf.mxu0 }
 0x45f   :  { %v2932_v30 = vpack.c.bf16 %v2923_v26, %v2922_v25  ;;  %v5794_v32 = vadd.f32 %v5793_v29, %v5792_v24  ;;  %v5857_v33 = vpop.f32.mrf.mxu1  ;;  %v2904_v34 = vadd.f32 %v5855_v31, %v2807_v27 }
 0x460   :  { %v5858_v36 = vadd.f32 %v5857_v33, %v5856_v28 }
 0x461   :  { %v2810_v35 = vadd.f32 %v5794_v32, %v6546_v14  ;;  %3220 = vmatmul.mubr.bf16.gmra.mxu0 %v2932_v30  ;;  %3333 = vmatmul.mubr.bf16.gmra.mxu1 %v2932_v30  ;;  %v2924_v38 = vmax.f32 %v2904_v34, 0.0 }
 0x462   :  { %3229 = vmatprep.mubr.bf16.mxu0 %v6432_v0  ;;  %3342 = vmatprep.mubr.bf16.mxu1 %v6432_v0 }
 0x463   :  { %v2907_v37 = vadd.f32 %v5858_v36, %v2810_v35 }
 0x465   :  { %v2925_v39 = vmax.f32 %v2907_v37, 0.0 }
 0x467   :  { %v2933_v40 = vpack.c.bf16 %v2925_v39, %v2924_v38 }
 0x469   :  { %3230 = vmatmul.mubr.bf16.gmra.mxu0 %v2933_v40  ;;  %3343 = vmatmul.mubr.bf16.gmra.mxu1 %v2933_v40 }
 0x46a   :  { %4161 = vmatprep.mubr.bf16.mxu0 %v6338_v41  ;;  %4258 = vmatprep.mubr.bf16.mxu1 %v6341_v42 }
 0x4f1   :  { %v3161_v43 = vpop.f32.mrf.mxu0  ;;  %v3274_v44 = vpop.f32.mrf.mxu1 }
 0x4f3   :  { %v3163_v14 = vpop.f32.mrf.mxu0  ;;  %v3276_v45 = vpop.f32.mrf.mxu1 }
 0x4f5   :  { %v3165_v47 = vpop.f32.mrf.mxu0  ;;  %v3278_v48 = vpop.f32.mrf.mxu1 }
 0x4f6   :  { %v5353_v49 = vpack.c.bf16 %v3165_v47, %v3161_v43  ;;  %v5433_v50 = vpack.c.bf16 %v3278_v48, %v3274_v44 }
 0x4f7   :  { %v3167_v51 = vpop.f32.mrf.mxu0  ;;  %v3280_v0 = vpop.f32.mrf.mxu1 }
 0x4f8   :  { %5354 = vst [vmem:[#allocation2] sm:$0xff] %v5353_v49   ;;  %5587 = vst [vmem:[#allocation2 + $0x80] sm:$0xff] %v5433_v50   ;;  %v5393_v52 = vpack.c.bf16 %v3167_v51, %v3163_v14  ;;  %v5473_v53 = vpack.c.bf16 %v3280_v0, %v3276_v45 }
 0x4f9   :  { %v3171_v54 = vpop.f32.mrf.mxu0  ;;  %v3284_v55 = vpop.f32.mrf.mxu1 }
 0x4fa   :  { %5579 = vst [vmem:[#allocation2 + $0x40] sm:$0xff] %v5393_v52   ;;  %5595 = vst [vmem:[#allocation2 + $0xc0] sm:$0xff] %v5473_v53  }
 0x4fb   :  { %v3173_v56 = vpop.f32.mrf.mxu0  ;;  %v3286_v57 = vpop.f32.mrf.mxu1 }
 0x4fd   :  { %v3175_v58 = vpop.f32.mrf.mxu0  ;;  %v3288_v59 = vpop.f32.mrf.mxu1 }
 0x4fe   :  { %v5358_v60 = vpack.c.bf16 %v3175_v58, %v3171_v54  ;;  %v5438_v61 = vpack.c.bf16 %v3288_v59, %v3284_v55 }
 0x4ff   :  { %v3177_v62 = vpop.f32.mrf.mxu0  ;;  %v3290_v63 = vpop.f32.mrf.mxu1 }
 0x500   :  { %5572 = vst [vmem:[#allocation2 + $0x8] sm:$0xff] %v5358_v60   ;;  %5588 = vst [vmem:[#allocation2 + $0x88] sm:$0xff] %v5438_v61   ;;  %v5398_v1 = vpack.c.bf16 %v3177_v62, %v3173_v56  ;;  %v5478_v2 = vpack.c.bf16 %v3290_v63, %v3286_v57 }
 0x501   :  { %v3181_v3 = vpop.f32.mrf.mxu0  ;;  %v3294_v4 = vpop.f32.mrf.mxu1 }
 0x502   :  { %5580 = vst [vmem:[#allocation2 + $0x48] sm:$0xff] %v5398_v1   ;;  %5596 = vst [vmem:[#allocation2 + $0xc8] sm:$0xff] %v5478_v2  }
 0x503   :  { %v3183_v5 = vpop.f32.mrf.mxu0  ;;  %v3296_v6 = vpop.f32.mrf.mxu1 }
 0x505   :  { %v3185_v7 = vpop.f32.mrf.mxu0  ;;  %v3298_v8 = vpop.f32.mrf.mxu1 }
 0x506   :  { %v5363_v9 = vpack.c.bf16 %v3185_v7, %v3181_v3  ;;  %v5443_v10 = vpack.c.bf16 %v3298_v8, %v3294_v4 }
 0x507   :  { %v3187_v11 = vpop.f32.mrf.mxu0  ;;  %v3300_v12 = vpop.f32.mrf.mxu1 }
 0x508   :  { %5573 = vst [vmem:[#allocation2 + $0x10] sm:$0xff] %v5363_v9   ;;  %5589 = vst [vmem:[#allocation2 + $0x90] sm:$0xff] %v5443_v10   ;;  %v5403_v13 = vpack.c.bf16 %v3187_v11, %v3183_v5  ;;  %v5483_v46 = vpack.c.bf16 %v3300_v12, %v3296_v6 }
 0x509   :  { %v3191_v15 = vpop.f32.mrf.mxu0  ;;  %v3304_v16 = vpop.f32.mrf.mxu1 }
 0x50a   :  { %5581 = vst [vmem:[#allocation2 + $0x50] sm:$0xff] %v5403_v13   ;;  %5597 = vst [vmem:[#allocation2 + $0xd0] sm:$0xff] %v5483_v46  }
 0x50b   :  { %v3193_v17 = vpop.f32.mrf.mxu0  ;;  %v3306_v18 = vpop.f32.mrf.mxu1 }
 0x50d   :  { %v3195_v19 = vpop.f32.mrf.mxu0  ;;  %v3308_v20 = vpop.f32.mrf.mxu1 }
 0x50e   :  { %v5368_v21 = vpack.c.bf16 %v3195_v19, %v3191_v15  ;;  %v5448_v22 = vpack.c.bf16 %v3308_v20, %v3304_v16 }
 0x50f   :  { %v3197_v23 = vpop.f32.mrf.mxu0  ;;  %v3310_v24 = vpop.f32.mrf.mxu1 }
 0x510   :  { %5574 = vst [vmem:[#allocation2 + $0x18] sm:$0xff] %v5368_v21   ;;  %5590 = vst [vmem:[#allocation2 + $0x98] sm:$0xff] %v5448_v22   ;;  %v5408_v25 = vpack.c.bf16 %v3197_v23, %v3193_v17  ;;  %v5488_v26 = vpack.c.bf16 %v3310_v24, %v3306_v18 }
 0x511   :  { %v3201_v27 = vpop.f32.mrf.mxu0  ;;  %v3314_v28 = vpop.f32.mrf.mxu1 }
 0x512   :  { %5582 = vst [vmem:[#allocation2 + $0x58] sm:$0xff] %v5408_v25   ;;  %5598 = vst [vmem:[#allocation2 + $0xd8] sm:$0xff] %v5488_v26  }
 0x513   :  { %v3203_v29 = vpop.f32.mrf.mxu0  ;;  %v3316_v30 = vpop.f32.mrf.mxu1 }
 0x515   :  { %v3205_v31 = vpop.f32.mrf.mxu0  ;;  %v3318_v32 = vpop.f32.mrf.mxu1 }
 0x516   :  { %v5373_v33 = vpack.c.bf16 %v3205_v31, %v3201_v27  ;;  %v5453_v34 = vpack.c.bf16 %v3318_v32, %v3314_v28  ;;  %v6324_v31 = vld [vmem:[#allocation2 + $0x50] sm:$0xff]  }
 0x517   :  { %v3207_v35 = vpop.f32.mrf.mxu0  ;;  %v3320_v36 = vpop.f32.mrf.mxu1  ;;  %v6325_v32 = vld [vmem:[#allocation2 + $0xd0] sm:$0xff]  }
 0x518   :  { %5575 = vst [vmem:[#allocation2 + $0x20] sm:$0xff] %v5373_v33   ;;  %5591 = vst [vmem:[#allocation2 + $0xa0] sm:$0xff] %v5453_v34   ;;  %v5413_v37 = vpack.c.bf16 %v3207_v35, %v3203_v29  ;;  %v5493_v38 = vpack.c.bf16 %v3320_v36, %v3316_v30  ;;  %v6322_v29 = vld [vmem:[#allocation2 + $0x18] sm:$0xff]   ;;  %v6326_v33 = vld [vmem:[#allocation2 + $0x10] sm:$0xff]  }
 0x519   :  { %v3211_v39 = vpop.f32.mrf.mxu0  ;;  %v3324_v40 = vpop.f32.mrf.mxu1  ;;  %v6320_v27 = vld [vmem:[#allocation2 + $0x58] sm:$0xff]   ;;  %v6327_v34 = vld [vmem:[#allocation2 + $0x90] sm:$0xff]   ;;  %v6328_v35 = vld [vmem:[#allocation2 + $0x48] sm:$0xff]  }
 0x51a   :  { %5583 = vst [vmem:[#allocation2 + $0x60] sm:$0xff] %v5413_v37   ;;  %5599 = vst [vmem:[#allocation2 + $0xe0] sm:$0xff] %v5493_v38   ;;  %v6321_v28 = vld [vmem:[#allocation2 + $0xd8] sm:$0xff]   ;;  %v6329_v36 = vld [vmem:[#allocation2 + $0xc8] sm:$0xff]  }
 0x51b   :  { %v3213_v41 = vpop.f32.mrf.mxu0  ;;  %v3326_v42 = vpop.f32.mrf.mxu1  ;;  %v6323_v30 = vld [vmem:[#allocation2 + $0x98] sm:$0xff]   ;;  %v6330_v37 = vld [vmem:[#allocation2 + $0x8] sm:$0xff]  }
 0x51c   :  { %v6331_v38 = vld [vmem:[#allocation2 + $0x88] sm:$0xff]  }
 0x51d   :  { %v3215_v43 = vpop.f32.mrf.mxu0  ;;  %v3328_v44 = vpop.f32.mrf.mxu1 }
 0x51e   :  { %v5378_v14 = vpack.c.bf16 %v3215_v43, %v3211_v39  ;;  %v5458_v45 = vpack.c.bf16 %v3328_v44, %v3324_v40  ;;  %v6332_v39 = vld [vmem:[#allocation2 + $0x40] sm:$0xff]   ;;  %v6339_v44 = vld [vmem:[#allocation3 + $0x8] ss:$16 sps:$4 sm:$0xff]  }
 0x51f   :  { %v3217_v47 = vpop.f32.mrf.mxu0  ;;  %v3330_v48 = vpop.f32.mrf.mxu1  ;;  %v6318_v25 = vld [vmem:[#allocation2 + $0x20] sm:$0xff]  }
 0x520   :  { %5576 = vst [vmem:[#allocation2 + $0x28] sm:$0xff] %v5378_v14   ;;  %5592 = vst [vmem:[#allocation2 + $0xa8] sm:$0xff] %v5458_v45   ;;  %v5418_v49 = vpack.c.bf16 %v3217_v47, %v3213_v41  ;;  %v5498_v50 = vpack.c.bf16 %v3330_v48, %v3326_v42  ;;  %v6319_v26 = vld [vmem:[#allocation2 + $0xa0] sm:$0xff]   ;;  %v6347_v45 = vld [vmem:[#allocation3 + $0x2c] ss:$16 sps:$4 sm:$0xff]  }
 0x521   :  { %v3221_v51 = vpop.f32.mrf.mxu0  ;;  %v3334_v0 = vpop.f32.mrf.mxu1  ;;  %v6316_v23 = vld [vmem:[#allocation2 + $0x60] sm:$0xff]   ;;  %v6345_v48 = vld [vmem:[#allocation3 + $0x28] ss:$16 sps:$4 sm:$0xff]  }
 0x522   :  { %5584 = vst [vmem:[#allocation2 + $0x68] sm:$0xff] %v5418_v49   ;;  %5600 = vst [vmem:[#allocation2 + $0xe8] sm:$0xff] %v5498_v50   ;;  %v6317_v24 = vld [vmem:[#allocation2 + $0xe0] sm:$0xff]   ;;  %v6353_v50 = vld [vmem:[#allocation3 + $0x4c] ss:$16 sps:$4 sm:$0xff]  }
 0x523   :  { %v3223_v52 = vpop.f32.mrf.mxu0  ;;  %v3336_v53 = vpop.f32.mrf.mxu1  ;;  %v6333_v40 = vld [vmem:[#allocation2 + $0xc0] sm:$0xff]  }
 0x524   :  { %v6334_v41 = vld [vmem:[#allocation2] sm:$0xff]  }
 0x525   :  { %v3225_v54 = vpop.f32.mrf.mxu0  ;;  %v3338_v55 = vpop.f32.mrf.mxu1  ;;  %v6335_v42 = vld [vmem:[#allocation2 + $0x80] sm:$0xff]  }
 0x526   :  { %v5383_v56 = vpack.c.bf16 %v3225_v54, %v3221_v51  ;;  %v5463_v57 = vpack.c.bf16 %v3338_v55, %v3334_v0  ;;  %v6336_v43 = vld [vmem:[#allocation3] ss:$16 sps:$4 sm:$0xff]   ;;  %v6344_v14 = vld [vmem:[#allocation3 + $0x24] ss:$16 sps:$4 sm:$0xff]   ;;  %v6351_v0 = vld [vmem:[#allocation3 + $0x48] ss:$16 sps:$4 sm:$0xff]  }
 0x527   :  { %v3227_v58 = vpop.f32.mrf.mxu0  ;;  %v3340_v59 = vpop.f32.mrf.mxu1  ;;  %v6314_v21 = vld [vmem:[#allocation2 + $0x28] sm:$0xff]   ;;  %v6342_v47 = vld [vmem:[#allocation3 + $0x20] ss:$16 sps:$4 sm:$0xff]   ;;  %v6350_v49 = vld [vmem:[#allocation3 + $0x44] ss:$16 sps:$4 sm:$0xff]  }
 0x528   :  { %5577 = vst [vmem:[#allocation2 + $0x30] sm:$0xff] %v5383_v56   ;;  %5593 = vst [vmem:[#allocation2 + $0xb0] sm:$0xff] %v5463_v57   ;;  %v5423_v60 = vpack.c.bf16 %v3227_v58, %v3223_v52  ;;  %v5503_v61 = vpack.c.bf16 %v3340_v59, %v3336_v53  ;;  %v6315_v22 = vld [vmem:[#allocation2 + $0xa8] sm:$0xff]   ;;  %v6348_v51 = vld [vmem:[#allocation3 + $0x40] ss:$16 sps:$4 sm:$0xff]  }
 0x529   :  { %v3231_v62 = vpop.f32.mrf.mxu0  ;;  %v3344_v63 = vpop.f32.mrf.mxu1  ;;  %v6312_v19 = vld [vmem:[#allocation2 + $0x68] sm:$0xff]   ;;  %v6356_v52 = vld [vmem:[#allocation3 + $0x64] ss:$16 sps:$4 sm:$0xff]   ;;  %v6354_v54 = vld [vmem:[#allocation3 + $0x60] ss:$16 sps:$4 sm:$0xff]  }
 0x52a   :  { %5585 = vst [vmem:[#allocation2 + $0x70] sm:$0xff] %v5423_v60   ;;  %5601 = vst [vmem:[#allocation2 + $0xf0] sm:$0xff] %v5503_v61   ;;  %v6313_v20 = vld [vmem:[#allocation2 + $0xe8] sm:$0xff]   ;;  %v6362_v56 = vld [vmem:[#allocation3 + $0x84] ss:$16 sps:$4 sm:$0xff]  }
 0x52b   :  { %v3233_v1 = vpop.f32.mrf.mxu0  ;;  %v3346_v2 = vpop.f32.mrf.mxu1  ;;  %v6359_v53 = vld [vmem:[#allocation3 + $0x6c] ss:$16 sps:$4 sm:$0xff]   ;;  %v6357_v55 = vld [vmem:[#allocation3 + $0x68] ss:$16 sps:$4 sm:$0xff]   ;;  %v6360_v58 = vld [vmem:[#allocation3 + $0x80] ss:$16 sps:$4 sm:$0xff]  }
 0x52c   :  { %v6365_v57 = vld [vmem:[#allocation3 + $0x8c] ss:$16 sps:$4 sm:$0xff]   ;;  %v6363_v59 = vld [vmem:[#allocation3 + $0x88] ss:$16 sps:$4 sm:$0xff]   ;;  %v6368_v60 = vld [vmem:[#allocation3 + $0xa4] ss:$16 sps:$4 sm:$0xff]  }
 0x52d   :  { %v3235_v3 = vpop.f32.mrf.mxu0  ;;  %v3348_v4 = vpop.f32.mrf.mxu1  ;;  %v6371_v61 = vld [vmem:[#allocation3 + $0xac] ss:$16 sps:$4 sm:$0xff]  }
 0x52e   :  { %v5388_v5 = vpack.c.bf16 %v3235_v3, %v3231_v62  ;;  %v5468_v6 = vpack.c.bf16 %v3348_v4, %v3344_v63  ;;  %v6366_v62 = vld [vmem:[#allocation3 + $0xa0] ss:$16 sps:$4 sm:$0xff]   ;;  %v6369_v63 = vld [vmem:[#allocation3 + $0xa8] ss:$16 sps:$4 sm:$0xff]  }
 0x52f   :  { %v3237_v7 = vpop.f32.mrf.mxu0  ;;  %v3350_v8 = vpop.f32.mrf.mxu1  ;;  %v6310_v17 = vld [vmem:[#allocation2 + $0x30] sm:$0xff]   ;;  %v6375_v4 = vld [vmem:[#allocation3 + $0xc8] ss:$16 sps:$4 sm:$0xff]  }
 0x530   :  { %5578 = vst [vmem:[#allocation2 + $0x38] sm:$0xff] %v5388_v5   ;;  %5594 = vst [vmem:[#allocation2 + $0xb8] sm:$0xff] %v5468_v6   ;;  %v5428_v9 = vpack.c.bf16 %v3237_v7, %v3233_v1  ;;  %v5508_v10 = vpack.c.bf16 %v3350_v8, %v3346_v2  ;;  %v6311_v18 = vld [vmem:[#allocation2 + $0xb0] sm:$0xff]   ;;  %v6377_v2 = vld [vmem:[#allocation3 + $0xcc] ss:$16 sps:$4 sm:$0xff]  }
 0x531   :  { %v6308_v15 = vld [vmem:[#allocation2 + $0x70] sm:$0xff]   ;;  %v6383_v6 = vld [vmem:[#allocation3 + $0xec] ss:$16 sps:$4 sm:$0xff]   ;;  %v6381_v8 = vld [vmem:[#allocation3 + $0xe8] ss:$16 sps:$4 sm:$0xff]  }
 0x532   :  { %5586 = vst [vmem:[#allocation2 + $0x78] sm:$0xff] %v5428_v9   ;;  %5602 = vst [vmem:[#allocation2 + $0xf8] sm:$0xff] %v5508_v10   ;;  %v6309_v16 = vld [vmem:[#allocation2 + $0xf0] sm:$0xff]  }
 0x533   :  { %v6374_v1 = vld [vmem:[#allocation3 + $0xc4] ss:$16 sps:$4 sm:$0xff]   ;;  %v6372_v3 = vld [vmem:[#allocation3 + $0xc0] ss:$16 sps:$4 sm:$0xff]  }
 0x534   :  { %v6380_v5 = vld [vmem:[#allocation3 + $0xe4] ss:$16 sps:$4 sm:$0xff]   ;;  %v6378_v7 = vld [vmem:[#allocation3 + $0xe0] ss:$16 sps:$4 sm:$0xff]  }
 0x537   :  { %v6306_v11 = vld [vmem:[#allocation2 + $0x38] sm:$0xff]  }
 0x538   :  { %v6307_v46 = vld [vmem:[#allocation2 + $0xb8] sm:$0xff]  }
 0x539   :  { %v6304_v12 = vld [vmem:[#allocation2 + $0x78] sm:$0xff]  }
 0x53a   :  { %v6305_v13 = vld [vmem:[#allocation2 + $0xf8] sm:$0xff]   ;;  %5859 = vmatprep.subr.bf16.mxu0 %v6304_v12 }
 0x53b   :  { %5923 = vmatprep.subr.bf16.mxu1 %v6305_v13  ;;  %5860 = vmatpush3.bf16.msra.mxu0 %v6306_v11  ;;  %v6581_v11 = vld [vmem:[%s6650_s3 + $0x2] ss:$0 sm:$0xff] }
 0x53c   :  { %5924 = vmatpush3.bf16.msra.mxu1 %v6307_v46  ;;  %5861 = vmatprep.subr.bf16.mxu0 %v6308_v15 }
 0x53d   :  { %5925 = vmatprep.subr.bf16.mxu1 %v6309_v16 }
 0x53f   :  { %5862 = vmatpush3.bf16.msra.mxu0 %v6310_v17 }
 0x540   :  { %5926 = vmatpush3.bf16.msra.mxu1 %v6311_v18  ;;  %5863 = vmatprep.subr.bf16.mxu0 %v6312_v19 }
 0x541   :  { %5927 = vmatprep.subr.bf16.mxu1 %v6313_v20 }
 0x543   :  { %5864 = vmatpush3.bf16.msra.mxu0 %v6314_v21 }
 0x544   :  { %5928 = vmatpush3.bf16.msra.mxu1 %v6315_v22  ;;  %5865 = vmatprep.subr.bf16.mxu0 %v6316_v23 }
 0x545   :  { %5929 = vmatprep.subr.bf16.mxu1 %v6317_v24 }
 0x547   :  { %5866 = vmatpush3.bf16.msra.mxu0 %v6318_v25 }
 0x548   :  { %5930 = vmatpush3.bf16.msra.mxu1 %v6319_v26  ;;  %5867 = vmatprep.subr.bf16.mxu0 %v6320_v27 }
 0x549   :  { %5931 = vmatprep.subr.bf16.mxu1 %v6321_v28 }
 0x54b   :  { %5868 = vmatpush3.bf16.msra.mxu0 %v6322_v29 }
 0x54c   :  { %5932 = vmatpush3.bf16.msra.mxu1 %v6323_v30  ;;  %5869 = vmatprep.subr.bf16.mxu0 %v6324_v31 }
 0x54d   :  { %5933 = vmatprep.subr.bf16.mxu1 %v6325_v32 }
 0x54f   :  { %5870 = vmatpush3.bf16.msra.mxu0 %v6326_v33 }
 0x550   :  { %5934 = vmatpush3.bf16.msra.mxu1 %v6327_v34  ;;  %5871 = vmatprep.subr.bf16.mxu0 %v6328_v35 }
 0x551   :  { %5935 = vmatprep.subr.bf16.mxu1 %v6329_v36 }
 0x553   :  { %5872 = vmatpush3.bf16.msra.mxu0 %v6330_v37 }
 0x554   :  { %5936 = vmatpush3.bf16.msra.mxu1 %v6331_v38  ;;  %5873 = vmatprep.subr.bf16.mxu0 %v6332_v39 }
 0x555   :  { %5937 = vmatprep.subr.bf16.mxu1 %v6333_v40 }
 0x557   :  { %5874 = vmatpush3.bf16.msra.mxu0 %v6334_v41 }
 0x558   :  { %5938 = vmatpush3.bf16.msra.mxu1 %v6335_v42 }
 0x55a   :  { %4162 = vmatmul.mubr.bf16.vlgmr.msra.gmra.mxu0 %v6336_v43 }
 0x55b   :  { %4259 = vmatmul.mubr.bf16.vlgmr.msra.gmra.mxu1 %v6339_v44  ;;  %4169 = vmatprep.mubr.bf16.mxu0 %v6344_v14 }
 0x55c   :  { %4266 = vmatprep.mubr.bf16.mxu1 %v6347_v45 }
 0x562   :  { %4170 = vmatmul.mubr.bf16.gmra.mxu0 %v6342_v47 }
 0x563   :  { %4267 = vmatmul.mubr.bf16.gmra.mxu1 %v6345_v48  ;;  %4177 = vmatprep.mubr.bf16.mxu0 %v6350_v49 }
 0x564   :  { %4274 = vmatprep.mubr.bf16.mxu1 %v6353_v50 }
 0x56a   :  { %4178 = vmatmul.mubr.bf16.gmra.mxu0 %v6348_v51 }
 0x56b   :  { %4275 = vmatmul.mubr.bf16.gmra.mxu1 %v6351_v0  ;;  %4185 = vmatprep.mubr.bf16.mxu0 %v6356_v52 }
 0x56c   :  { %4282 = vmatprep.mubr.bf16.mxu1 %v6359_v53 }
 0x572   :  { %4186 = vmatmul.mubr.bf16.gmra.mxu0 %v6354_v54 }
 0x573   :  { %4283 = vmatmul.mubr.bf16.gmra.mxu1 %v6357_v55  ;;  %4193 = vmatprep.mubr.bf16.mxu0 %v6362_v56 }
 0x574   :  { %4290 = vmatprep.mubr.bf16.mxu1 %v6365_v57 }
 0x57a   :  { %4194 = vmatmul.mubr.bf16.gmra.mxu0 %v6360_v58 }
 0x57b   :  { %4291 = vmatmul.mubr.bf16.gmra.mxu1 %v6363_v59  ;;  %4201 = vmatprep.mubr.bf16.mxu0 %v6368_v60 }
 0x57c   :  { %4298 = vmatprep.mubr.bf16.mxu1 %v6371_v61 }
 0x582   :  { %4202 = vmatmul.mubr.bf16.gmra.mxu0 %v6366_v62 }
 0x583   :  { %4299 = vmatmul.mubr.bf16.gmra.mxu1 %v6369_v63  ;;  %4209 = vmatprep.mubr.bf16.mxu0 %v6374_v1 }
 0x584   :  { %4306 = vmatprep.mubr.bf16.mxu1 %v6377_v2 }
 0x58a   :  { %4210 = vmatmul.mubr.bf16.gmra.mxu0 %v6372_v3 }
 0x58b   :  { %4307 = vmatmul.mubr.bf16.gmra.mxu1 %v6375_v4  ;;  %4217 = vmatprep.mubr.bf16.mxu0 %v6380_v5 }
 0x58c   :  { %4314 = vmatprep.mubr.bf16.mxu1 %v6383_v6 }
 0x592   :  { %4218 = vmatmul.mubr.bf16.gmra.mxu0 %v6378_v7 }
 0x593   :  { %4315 = vmatmul.mubr.bf16.gmra.mxu1 %v6381_v8 }
 0x61a   :  { %v5875_v9 = vpop.f32.mrf.mxu0 }
 0x61b   :  { %v5939_v10 = vpop.f32.mrf.mxu1 }
 0x61c   :  { %v5876_v12 = vpop.f32.mrf.mxu0 }
 0x61d   :  { %v5877_v13 = vadd.f32 %v5876_v12, %v5875_v9  ;;  %v5940_v46 = vpop.f32.mrf.mxu1 }
 0x61e   :  { %v5878_v15 = vpop.f32.mrf.mxu0  ;;  %v5941_v17 = vadd.f32 %v5940_v46, %v5939_v10 }
 0x61f   :  { %v4164_v16 = vadd.f32 %v5877_v13, %v6581_v11  ;;  %v5942_v18 = vpop.f32.mrf.mxu1 }
 0x620   :  { %v5879_v19 = vpop.f32.mrf.mxu0 }
 0x621   :  { %v4261_v20 = vadd.f32 %v5941_v17, %v4164_v16  ;;  %v5880_v21 = vadd.f32 %v5879_v19, %v5878_v15  ;;  %v5943_v22 = vpop.f32.mrf.mxu1 }
 0x622   :  { %v5881_v23 = vpop.f32.mrf.mxu0  ;;  %v5944_v25 = vadd.f32 %v5943_v22, %v5942_v18 }
 0x623   :  { %4323 = vst [vmem:[%s6651_s4] sm:$0xff] %v4261_v20  ;;  %v4167_v24 = vadd.f32 %v5880_v21, %v6581_v11  ;;  %v5945_v26 = vpop.f32.mrf.mxu1 }
 0x624   :  { %v5882_v27 = vpop.f32.mrf.mxu0 }
 0x625   :  { %v4264_v28 = vadd.f32 %v5944_v25, %v4167_v24  ;;  %v5883_v29 = vadd.f32 %v5882_v27, %v5881_v23  ;;  %v5946_v30 = vpop.f32.mrf.mxu1 }
 0x626   :  { %v5884_v31 = vpop.f32.mrf.mxu0  ;;  %v5947_v33 = vadd.f32 %v5946_v30, %v5945_v26 }
 0x627   :  { %4324 = vst [vmem:[%s6651_s4 + $0x8] sm:$0xff] %v4264_v28  ;;  %v4172_v32 = vadd.f32 %v5883_v29, %v6581_v11  ;;  %v5948_v34 = vpop.f32.mrf.mxu1 }
 0x628   :  { %v5885_v35 = vpop.f32.mrf.mxu0 }
 0x629   :  { %v4269_v36 = vadd.f32 %v5947_v33, %v4172_v32  ;;  %v5886_v37 = vadd.f32 %v5885_v35, %v5884_v31  ;;  %v5949_v38 = vpop.f32.mrf.mxu1 }
 0x62a   :  { %v5887_v39 = vpop.f32.mrf.mxu0  ;;  %v5950_v41 = vadd.f32 %v5949_v38, %v5948_v34 }
 0x62b   :  { %4325 = vst [vmem:[%s6651_s4 + $0x10] sm:$0xff] %v4269_v36  ;;  %v4175_v40 = vadd.f32 %v5886_v37, %v6581_v11  ;;  %v5951_v42 = vpop.f32.mrf.mxu1 }
 0x62c   :  { %v5888_v43 = vpop.f32.mrf.mxu0 }
 0x62d   :  { %v4272_v44 = vadd.f32 %v5950_v41, %v4175_v40  ;;  %v5889_v14 = vadd.f32 %v5888_v43, %v5887_v39  ;;  %v5952_v45 = vpop.f32.mrf.mxu1 }
 0x62e   :  { %v5890_v47 = vpop.f32.mrf.mxu0  ;;  %v5953_v49 = vadd.f32 %v5952_v45, %v5951_v42 }
 0x62f   :  { %4326 = vst [vmem:[%s6651_s4 + $0x18] sm:$0xff] %v4272_v44  ;;  %v4180_v48 = vadd.f32 %v5889_v14, %v6581_v11  ;;  %v5954_v50 = vpop.f32.mrf.mxu1 }
 0x630   :  { %v5891_v51 = vpop.f32.mrf.mxu0 }
 0x631   :  { %v4277_v0 = vadd.f32 %v5953_v49, %v4180_v48  ;;  %v5892_v52 = vadd.f32 %v5891_v51, %v5890_v47  ;;  %v5955_v53 = vpop.f32.mrf.mxu1 }
 0x632   :  { %v5893_v54 = vpop.f32.mrf.mxu0  ;;  %v5956_v56 = vadd.f32 %v5955_v53, %v5954_v50 }
 0x633   :  { %4327 = vst [vmem:[%s6651_s4 + $0x20] sm:$0xff] %v4277_v0  ;;  %v4183_v55 = vadd.f32 %v5892_v52, %v6581_v11  ;;  %v5957_v57 = vpop.f32.mrf.mxu1 }
 0x634   :  { %v5894_v58 = vpop.f32.mrf.mxu0 }
 0x635   :  { %v4280_v59 = vadd.f32 %v5956_v56, %v4183_v55  ;;  %v5895_v60 = vadd.f32 %v5894_v58, %v5893_v54  ;;  %v5958_v61 = vpop.f32.mrf.mxu1 }
 0x636   :  { %v5896_v62 = vpop.f32.mrf.mxu0  ;;  %v5959_v1 = vadd.f32 %v5958_v61, %v5957_v57 }
 0x637   :  { %4328 = vst [vmem:[%s6651_s4 + $0x28] sm:$0xff] %v4280_v59  ;;  %v4188_v63 = vadd.f32 %v5895_v60, %v6581_v11  ;;  %v5960_v2 = vpop.f32.mrf.mxu1 }
 0x638   :  { %v5897_v3 = vpop.f32.mrf.mxu0 }
 0x639   :  { %v4285_v4 = vadd.f32 %v5959_v1, %v4188_v63  ;;  %v5898_v5 = vadd.f32 %v5897_v3, %v5896_v62  ;;  %v5961_v6 = vpop.f32.mrf.mxu1 }
 0x63a   :  { %v5899_v7 = vpop.f32.mrf.mxu0  ;;  %v5962_v9 = vadd.f32 %v5961_v6, %v5960_v2 }
 0x63b   :  { %4329 = vst [vmem:[%s6651_s4 + $0x30] sm:$0xff] %v4285_v4  ;;  %v4191_v8 = vadd.f32 %v5898_v5, %v6581_v11  ;;  %v5963_v10 = vpop.f32.mrf.mxu1 }
 0x63c   :  { %v5900_v12 = vpop.f32.mrf.mxu0 }
 0x63d   :  { %v4288_v13 = vadd.f32 %v5962_v9, %v4191_v8  ;;  %v5901_v46 = vadd.f32 %v5900_v12, %v5899_v7  ;;  %v5964_v15 = vpop.f32.mrf.mxu1 }
 0x63e   :  { %v5902_v16 = vpop.f32.mrf.mxu0  ;;  %v5965_v18 = vadd.f32 %v5964_v15, %v5963_v10 }
 0x63f   :  { %4330 = vst [vmem:[%s6651_s4 + $0x38] sm:$0xff] %v4288_v13  ;;  %v4196_v17 = vadd.f32 %v5901_v46, %v6581_v11  ;;  %v5966_v19 = vpop.f32.mrf.mxu1 }
 0x640   :  { %v5903_v20 = vpop.f32.mrf.mxu0 }
 0x641   :  { %v4293_v21 = vadd.f32 %v5965_v18, %v4196_v17  ;;  %v5904_v22 = vadd.f32 %v5903_v20, %v5902_v16  ;;  %v5967_v23 = vpop.f32.mrf.mxu1 }
 0x642   :  { %v5905_v24 = vpop.f32.mrf.mxu0  ;;  %v5968_v26 = vadd.f32 %v5967_v23, %v5966_v19 }
 0x643   :  { %4331 = vst [vmem:[%s6651_s4 + $0x40] sm:$0xff] %v4293_v21  ;;  %v4199_v25 = vadd.f32 %v5904_v22, %v6581_v11  ;;  %v5969_v27 = vpop.f32.mrf.mxu1 }
 0x644   :  { %v5906_v28 = vpop.f32.mrf.mxu0 }
 0x645   :  { %v4296_v29 = vadd.f32 %v5968_v26, %v4199_v25  ;;  %v5907_v30 = vadd.f32 %v5906_v28, %v5905_v24  ;;  %v5970_v31 = vpop.f32.mrf.mxu1 }
 0x646   :  { %v5908_v32 = vpop.f32.mrf.mxu0  ;;  %v5971_v34 = vadd.f32 %v5970_v31, %v5969_v27 }
 0x647   :  { %4332 = vst [vmem:[%s6651_s4 + $0x48] sm:$0xff] %v4296_v29  ;;  %v4204_v33 = vadd.f32 %v5907_v30, %v6581_v11  ;;  %v5972_v35 = vpop.f32.mrf.mxu1 }
 0x648   :  { %v5909_v36 = vpop.f32.mrf.mxu0 }
 0x649   :  { %v4301_v37 = vadd.f32 %v5971_v34, %v4204_v33  ;;  %v5910_v38 = vadd.f32 %v5909_v36, %v5908_v32  ;;  %v5973_v39 = vpop.f32.mrf.mxu1 }
 0x64a   :  { %v5911_v40 = vpop.f32.mrf.mxu0  ;;  %v5974_v42 = vadd.f32 %v5973_v39, %v5972_v35 }
 0x64b   :  { %4333 = vst [vmem:[%s6651_s4 + $0x50] sm:$0xff] %v4301_v37  ;;  %v4207_v41 = vadd.f32 %v5910_v38, %v6581_v11  ;;  %v5975_v43 = vpop.f32.mrf.mxu1 }
 0x64c   :  { %v5912_v44 = vpop.f32.mrf.mxu0 }
 0x64d   :  { %v4304_v14 = vadd.f32 %v5974_v42, %v4207_v41  ;;  %v5913_v45 = vadd.f32 %v5912_v44, %v5911_v40  ;;  %v5976_v47 = vpop.f32.mrf.mxu1 }
 0x64e   :  { %v5914_v48 = vpop.f32.mrf.mxu0  ;;  %v5977_v50 = vadd.f32 %v5976_v47, %v5975_v43 }
 0x64f   :  { %4334 = vst [vmem:[%s6651_s4 + $0x58] sm:$0xff] %v4304_v14  ;;  %v4212_v49 = vadd.f32 %v5913_v45, %v6581_v11  ;;  %v5978_v51 = vpop.f32.mrf.mxu1 }
 0x650   :  { %v5915_v0 = vpop.f32.mrf.mxu0 }
 0x651   :  { %v4309_v52 = vadd.f32 %v5977_v50, %v4212_v49  ;;  %v5916_v53 = vadd.f32 %v5915_v0, %v5914_v48  ;;  %v5979_v54 = vpop.f32.mrf.mxu1 }
 0x652   :  { %v5917_v55 = vpop.f32.mrf.mxu0  ;;  %v5980_v57 = vadd.f32 %v5979_v54, %v5978_v51 }
 0x653   :  { %4335 = vst [vmem:[%s6651_s4 + $0x60] sm:$0xff] %v4309_v52  ;;  %v4215_v56 = vadd.f32 %v5916_v53, %v6581_v11  ;;  %v5981_v58 = vpop.f32.mrf.mxu1 }
 0x654   :  { %v5918_v59 = vpop.f32.mrf.mxu0 }
 0x655   :  { %v4312_v60 = vadd.f32 %v5980_v57, %v4215_v56  ;;  %v5919_v61 = vadd.f32 %v5918_v59, %v5917_v55  ;;  %v5982_v62 = vpop.f32.mrf.mxu1 }
 0x656   :  { %v5920_v63 = vpop.f32.mrf.mxu0  ;;  %v5983_v2 = vadd.f32 %v5982_v62, %v5981_v58 }
 0x657   :  { %4336 = vst [vmem:[%s6651_s4 + $0x68] sm:$0xff] %v4312_v60  ;;  %v4220_v1 = vadd.f32 %v5919_v61, %v6581_v11  ;;  %v5984_v3 = vpop.f32.mrf.mxu1 }
 0x658   :  { %v5921_v4 = vpop.f32.mrf.mxu0 }
 0x659   :  { %v4317_v5 = vadd.f32 %v5983_v2, %v4220_v1  ;;  %v5922_v6 = vadd.f32 %v5921_v4, %v5920_v63  ;;  %v5985_v7 = vpop.f32.mrf.mxu1 }
 0x65a   :  { %v5986_v9 = vadd.f32 %v5985_v7, %v5984_v3 }
 0x65b   :  { %4337 = vst [vmem:[%s6651_s4 + $0x70] sm:$0xff] %v4317_v5  ;;  %v4223_v8 = vadd.f32 %v5922_v6, %v6581_v11 }
 0x65d   :  { %v4320_v10 = vadd.f32 %v5986_v9, %v4223_v8 }
 0x65f   :  { %4338 = vst [vmem:[%s6651_s4 + $0x78] sm:$0xff] %v4320_v10 }
 0x660   :  { %4343 = vsyncpa [#allocation4], 1 }
 0x661   :  { %4344 = vsyncpa [#allocation6], 1 }

</bundles_post_ra>
